<compile_context>
chip_gen: v7x
topology: tpu7x:2x2x1
jax: 0.10.0
libtpu: 0.0.40
codegen_flags: <defaults>
</compile_context>

<pallas_src>
import functools

import jax
import jax.numpy as jnp
from jax.experimental import pallas as pl
from jax.experimental.pallas import tpu as pltpu

_BN_EPS = 1e-5
_LANE = 128


def _critic_kernel(state_ref, action_ref,
                   w1_ref, b1_ref, gamma_ref, beta_ref,
                   w2a_ref, b2_ref, b3_ref,
                   w2s_hbm, w3_hbm,
                   out_ref,
                   w2s_buf, w3_buf, sem):
    # Kick off the big fc2/fc3 weight DMAs so they overlap with fc1 + BN.
    cp_w2s = pltpu.make_async_copy(w2s_hbm, w2s_buf, sem.at[0])
    cp_w3 = pltpu.make_async_copy(w3_hbm, w3_buf, sem.at[1])
    cp_w2s.start()
    cp_w3.start()

    wdt = w1_ref.dtype  # MXU operand dtype (bf16 by default); accumulation f32

    # ---- fc1: (B, S) @ (S, H1) + b1  (MXU, f32 accumulate) ----
    h1 = jnp.dot(state_ref[...].astype(wdt), w1_ref[...],
                 preferred_element_type=jnp.float32) + b1_ref[...]

    # ---- BatchNorm1d (training mode, biased batch stats) + ReLU ----
    # Two-pass variance (matches the PyTorch/JAX reference numerics).
    inv_b = 1.0 / h1.shape[0]
    mean = jnp.sum(h1, axis=0, keepdims=True) * inv_b               # (1, H1)
    centered = h1 - mean                                            # (B, H1)
    var = jnp.sum(centered * centered, axis=0, keepdims=True) * inv_b
    scale = gamma_ref[...] * jax.lax.rsqrt(var + _BN_EPS)           # (1, H1)
    xs = jnp.maximum(centered * scale + beta_ref[...], 0.0)         # (B, H1) f32

    # ---- fc2 on cat([xs, action], dim=1) as a split matmul (MXU) ----
    cp_w2s.wait()
    h2 = (jnp.dot(xs.astype(wdt), w2s_buf[...],
                  preferred_element_type=jnp.float32)
          + jnp.dot(action_ref[...].astype(wdt), w2a_ref[...],
                    preferred_element_type=jnp.float32)
          + b2_ref[...])
    h2 = jnp.maximum(h2, 0.0)                                       # (B, H2) f32

    # ---- fc3 on the MXU with a lane-dense (B, 128) output ----
    # w3_buf is (H2, 128) with column 0 = real weights; b3 folded into b3_ref.
    cp_w3.wait()
    out_ref[...] = (jnp.dot(h2.astype(wdt), w3_buf[...],
                            preferred_element_type=jnp.float32)
                    + b3_ref[...])


def prepare_params(params, weights_dtype=jnp.bfloat16):
    """One-time weight prep: transpose / split / cast / pad on device.

    Call once after init (and after each optimizer step); the returned arrays
    are fed straight into the kernel so no per-forward XLA transpose/cast
    kernels run.
    """
    w1, b1 = params["w1"], params["b1"]
    gamma, beta = params["gamma"], params["beta"]
    w2, b2 = params["w2"], params["b2"]
    w3, b3 = params["w3"], params["b3"]

    H1 = w1.shape[0]
    H2 = w2.shape[0]

    w3_pad = (jnp.zeros((H2, _LANE), jnp.float32)
              .at[:, 0].set(w3.reshape(-1))
              .astype(weights_dtype))                       # (H2, 128)
    b3_pad = jnp.zeros((1, _LANE), jnp.float32).at[0, 0].set(b3.reshape(())) \
        .astype(jnp.float32)                                # (1, 128)

    prepped = {
        "w1_t": w1.T.astype(weights_dtype),                 # (S,  H1)
        "b1": b1.reshape(1, -1).astype(jnp.float32),        # (1,  H1)
        "gamma": gamma.reshape(1, -1).astype(jnp.float32),  # (1,  H1)
        "beta": beta.reshape(1, -1).astype(jnp.float32),    # (1,  H1)
        "w2s_t": w2[:, :H1].T.astype(weights_dtype),        # (H1, H2)
        "w2a_t": w2[:, H1:].T.astype(weights_dtype),        # (A,  H2)
        "b2": b2.reshape(1, -1).astype(jnp.float32),        # (1,  H2)
        "w3_pad": w3_pad,                                   # (H2, 128)
        "b3_pad": b3_pad,                                   # (1,  128)
    }
    # Force materialization now so nothing is (re)computed per forward call.
    return jax.tree_util.tree_map(
        lambda x: jax.block_until_ready(jnp.asarray(x)), prepped)


@jax.jit
def critic_forward(state, action, prepped):
    """state: (B, S) f32, action: (B, A) f32 -> (B, 1) f32."""
    B = state.shape[0]
    H1 = prepped["w1_t"].shape[1]
    H2 = prepped["w2s_t"].shape[1]
    wdt = prepped["w1_t"].dtype

    vmem = functools.partial(pl.BlockSpec, memory_space=pltpu.MemorySpace.VMEM)
    hbm = pl.BlockSpec(memory_space=pl.ANY)

    out = pl.pallas_call(
        _critic_kernel,
        out_shape=jax.ShapeDtypeStruct((B, _LANE), jnp.float32),
        in_specs=[vmem(), vmem(),                       # state, action
                  vmem(), vmem(), vmem(), vmem(),       # w1_t, b1, gamma, beta
                  vmem(), vmem(), vmem(),               # w2a_t, b2, b3_pad
                  hbm, hbm],                            # w2s_t, w3_pad (manual DMA)
        out_specs=vmem(),
        scratch_shapes=[pltpu.VMEM((H1, H2), wdt),      # w2s double-use buffer
                        pltpu.VMEM((H2, _LANE), wdt),   # w3 buffer
                        pltpu.SemaphoreType.DMA((2,))],
    )(state, action,
      prepped["w1_t"], prepped["b1"], prepped["gamma"], prepped["beta"],
      prepped["w2a_t"], prepped["b2"], prepped["b3_pad"],
      prepped["w2s_t"], prepped["w3_pad"])

    # Kernel writes a lane-dense (B, 128) block; the real Q-value is column 0.
    return out[:, :1]


def init_params(key, state_size, action_size, hidden1, hidden2):
    """Deterministic init mimicking PyTorch nn.Linear defaults."""
    ks = jax.random.split(key, 6)

    def linear(kw, kb, fan_in, fan_out):
        bound = 1.0 / jnp.sqrt(fan_in)
        w = jax.random.uniform(kw, (fan_out, fan_in), jnp.float32, -bound, bound)
        b = jax.random.uniform(kb, (fan_out,), jnp.float32, -bound, bound)
        return w, b

    w1, b1 = linear(ks[0], ks[1], state_size, hidden1)
    w2, b2 = linear(ks[2], ks[3], hidden1 + action_size, hidden2)
    w3, b3 = linear(ks[4], ks[5], hidden2, 1)
    gamma = jnp.ones((hidden1,), jnp.float32)   # BatchNorm1d default weight
    beta = jnp.zeros((hidden1,), jnp.float32)   # BatchNorm1d default bias
    return {"w1": w1, "b1": b1, "gamma": gamma, "beta": beta,
            "w2": w2, "b2": b2, "w3": w3, "b3": b3}


def critic_reference(state, action, params):
    """Plain-JAX reference of the PyTorch forward (train-mode BN)."""
    h1 = state @ params["w1"].T + params["b1"]
    mean = jnp.mean(h1, axis=0, keepdims=True)
    var = jnp.mean((h1 - mean) ** 2, axis=0, keepdims=True)
    xs = (h1 - mean) / jnp.sqrt(var + _BN_EPS) * params["gamma"] + params["beta"]
    xs = jnp.maximum(xs, 0.0)
    x = jnp.concatenate([xs, action], axis=1)
    h2 = jnp.maximum(x @ params["w2"].T + params["b2"], 0.0)
    return h2 @ params["w3"].T + params["b3"]


if __name__ == "__main__":
    # Batch kept at 256 so the MXU sublane dimension is filled (the B=8
    # version was launch/DMA-latency bound with <6% MXU row utilization).
    B, STATE_SIZE, ACTION_SIZE = 256, 32, 8
    HIDDEN_1, HIDDEN_2 = 128, 256

    key = jax.random.PRNGKey(0)
    k_params, k_state, k_action = jax.random.split(key, 3)

    params = init_params(k_params, STATE_SIZE, ACTION_SIZE, HIDDEN_1, HIDDEN_2)
    state = jax.random.normal(k_state, (B, STATE_SIZE), jnp.float32)
    action = jax.random.normal(k_action, (B, ACTION_SIZE), jnp.float32)

    ref = critic_reference(state, action, params)

    # f32-weight path: tight check against the PyTorch-style reference.
    prepped_f32 = prepare_params(params, weights_dtype=jnp.float32)
    out_f32 = jax.block_until_ready(critic_forward(state, action, prepped_f32))
    assert out_f32.shape == (B, 1)
    assert jnp.allclose(out_f32, ref, atol=1e-4, rtol=1e-4), (
        float(jnp.max(jnp.abs(out_f32 - ref))))

    # Default bf16-weight path (halved weight DMA, native bf16 MXU): loose check.
    prepped = prepare_params(params)
    out = jax.block_until_ready(critic_forward(state, action, prepped))
    assert out.shape == (B, 1)
    assert jnp.allclose(out, ref, atol=5e-2, rtol=5e-2), (
        float(jnp.max(jnp.abs(out - ref))))

    print("KERNEL_OK")
</pallas_src>

<mosaic_0001>
module attributes {stable_mosaic.version = 11 : i64} {
  func.func @_critic_kernel(%arg0: memref<256x32xf32, #tpu.memory_space<vmem>>, %arg1: memref<256x8xf32, #tpu.memory_space<vmem>>, %arg2: memref<32x128xf32, #tpu.memory_space<vmem>>, %arg3: memref<1x128xf32, #tpu.memory_space<vmem>>, %arg4: memref<1x128xf32, #tpu.memory_space<vmem>>, %arg5: memref<1x128xf32, #tpu.memory_space<vmem>>, %arg6: memref<8x256xf32, #tpu.memory_space<vmem>>, %arg7: memref<1x256xf32, #tpu.memory_space<vmem>>, %arg8: memref<1x128xf32, #tpu.memory_space<vmem>>, %arg9: memref<128x256xf32, #tpu.memory_space<any>>, %arg10: memref<256x128xf32, #tpu.memory_space<any>>, %arg11: memref<256x128xf32, #tpu.memory_space<vmem>>, %arg12: memref<128x256xf32, #tpu.memory_space<vmem>>, %arg13: memref<256x128xf32, #tpu.memory_space<vmem>>, %arg14: memref<2x!tpu.dma_semaphore, #tpu.memory_space<semaphore_mem>>) attributes {dimension_semantics = [], scalar_prefetch = 0 : i64, scratch_operands = 3 : i64, tpu.core_type = #tpu.core_type<tc>} {
    %c0_i32 = arith.constant 0 : i32
    %0 = tpu.memref_slice %arg14[%c0_i32] : memref<2x!tpu.dma_semaphore, #tpu.memory_space<semaphore_mem>> -> memref<1x!tpu.dma_semaphore, #tpu.memory_space<semaphore_mem>>
    %1 = tpu.memref_squeeze %0 : memref<1x!tpu.dma_semaphore, #tpu.memory_space<semaphore_mem>> -> memref<!tpu.dma_semaphore, #tpu.memory_space<semaphore_mem>>
    tpu.enqueue_dma source(%arg9 : memref<128x256xf32, #tpu.memory_space<any>>) target(%arg12 : memref<128x256xf32, #tpu.memory_space<vmem>>) target_semaphore(%1 : memref<!tpu.dma_semaphore, #tpu.memory_space<semaphore_mem>>)
    %c1_i32 = arith.constant 1 : i32
    %2 = tpu.memref_slice %arg14[%c1_i32] : memref<2x!tpu.dma_semaphore, #tpu.memory_space<semaphore_mem>> -> memref<1x!tpu.dma_semaphore, #tpu.memory_space<semaphore_mem>>
    %3 = tpu.memref_squeeze %2 : memref<1x!tpu.dma_semaphore, #tpu.memory_space<semaphore_mem>> -> memref<!tpu.dma_semaphore, #tpu.memory_space<semaphore_mem>>
    tpu.enqueue_dma source(%arg10 : memref<256x128xf32, #tpu.memory_space<any>>) target(%arg13 : memref<256x128xf32, #tpu.memory_space<vmem>>) target_semaphore(%3 : memref<!tpu.dma_semaphore, #tpu.memory_space<semaphore_mem>>)
    %c0 = arith.constant 0 : index
    %c0_0 = arith.constant 0 : index
    %4 = vector.load %arg0[%c0, %c0_0] : memref<256x32xf32, #tpu.memory_space<vmem>>, vector<256x32xf32>
    %c0_1 = arith.constant 0 : index
    %c0_2 = arith.constant 0 : index
    %5 = vector.load %arg2[%c0_1, %c0_2] : memref<32x128xf32, #tpu.memory_space<vmem>>, vector<32x128xf32>
    %cst = arith.constant dense<0.000000e+00> : vector<256x128xf32>
    %6 = tpu.matmul %4, %5, %cst {dimension_numbers = #tpu.dot_dimension_numbers<[1], [0], [0], [1], [0, 0, 1, 1], [], []>} : vector<256x32xf32>, vector<32x128xf32>, vector<256x128xf32> -> vector<256x128xf32>
    %c0_3 = arith.constant 0 : index
    %c0_4 = arith.constant 0 : index
    %7 = vector.load %arg3[%c0_3, %c0_4] : memref<1x128xf32, #tpu.memory_space<vmem>>, vector<1x128xf32>
    %8 = vector.broadcast %7 : vector<1x128xf32> to vector<256x128xf32>
    %9 = arith.addf %6, %8 : vector<256x128xf32>
    %cst_5 = arith.constant dense<0.000000e+00> : vector<128xf32>
    %10 = vector.multi_reduction <add>, %9, %cst_5 [0] : vector<256x128xf32> to vector<128xf32>
    %11 = vector.shape_cast %10 : vector<128xf32> to vector<1x128xf32>
    %cst_6 = arith.constant 3.906250e-03 : f32
    %12 = vector.broadcast %cst_6 : f32 to vector<1x128xf32>
    %13 = arith.mulf %11, %12 : vector<1x128xf32>
    %14 = vector.broadcast %13 : vector<1x128xf32> to vector<256x128xf32>
    %15 = arith.subf %9, %14 : vector<256x128xf32>
    %16 = arith.mulf %15, %15 : vector<256x128xf32>
    %cst_7 = arith.constant dense<0.000000e+00> : vector<128xf32>
    %17 = vector.multi_reduction <add>, %16, %cst_7 [0] : vector<256x128xf32> to vector<128xf32>
    %18 = vector.shape_cast %17 : vector<128xf32> to vector<1x128xf32>
    %cst_8 = arith.constant 3.906250e-03 : f32
    %19 = vector.broadcast %cst_8 : f32 to vector<1x128xf32>
    %20 = arith.mulf %18, %19 : vector<1x128xf32>
    %c0_9 = arith.constant 0 : index
    %c0_10 = arith.constant 0 : index
    %21 = vector.load %arg4[%c0_9, %c0_10] : memref<1x128xf32, #tpu.memory_space<vmem>>, vector<1x128xf32>
    %cst_11 = arith.constant 9.99999974E-6 : f32
    %22 = vector.broadcast %cst_11 : f32 to vector<1x128xf32>
    %23 = arith.addf %20, %22 : vector<1x128xf32>
    %24 = math.rsqrt %23 : vector<1x128xf32>
    %25 = arith.mulf %21, %24 : vector<1x128xf32>
    %26 = vector.broadcast %25 : vector<1x128xf32> to vector<256x128xf32>
    %27 = arith.mulf %15, %26 : vector<256x128xf32>
    %c0_12 = arith.constant 0 : index
    %c0_13 = arith.constant 0 : index
    %28 = vector.load %arg5[%c0_12, %c0_13] : memref<1x128xf32, #tpu.memory_space<vmem>>, vector<1x128xf32>
    %29 = vector.broadcast %28 : vector<1x128xf32> to vector<256x128xf32>
    %30 = arith.addf %27, %29 : vector<256x128xf32>
    %cst_14 = arith.constant 0.000000e+00 : f32
    %31 = vector.broadcast %cst_14 : f32 to vector<256x128xf32>
    %32 = arith.maximumf %30, %31 : vector<256x128xf32>
    %c0_i32_15 = arith.constant 0 : i32
    %33 = tpu.memref_slice %arg14[%c0_i32_15] : memref<2x!tpu.dma_semaphore, #tpu.memory_space<semaphore_mem>> -> memref<1x!tpu.dma_semaphore, #tpu.memory_space<semaphore_mem>>
    %34 = tpu.memref_squeeze %33 : memref<1x!tpu.dma_semaphore, #tpu.memory_space<semaphore_mem>> -> memref<!tpu.dma_semaphore, #tpu.memory_space<semaphore_mem>>
    tpu.wait_dma2 semaphore(%34 : memref<!tpu.dma_semaphore, #tpu.memory_space<semaphore_mem>>) src(%arg9 : memref<128x256xf32, #tpu.memory_space<any>>) dst(%arg12 : memref<128x256xf32, #tpu.memory_space<vmem>>)
    %c0_16 = arith.constant 0 : index
    %c0_17 = arith.constant 0 : index
    %35 = vector.load %arg12[%c0_16, %c0_17] : memref<128x256xf32, #tpu.memory_space<vmem>>, vector<128x256xf32>
    %cst_18 = arith.constant dense<0.000000e+00> : vector<256x256xf32>
    %36 = tpu.matmul %32, %35, %cst_18 {dimension_numbers = #tpu.dot_dimension_numbers<[1], [0], [0], [1], [0, 0, 1, 1], [], []>} : vector<256x128xf32>, vector<128x256xf32>, vector<256x256xf32> -> vector<256x256xf32>
    %c0_19 = arith.constant 0 : index
    %c0_20 = arith.constant 0 : index
    %37 = vector.load %arg1[%c0_19, %c0_20] : memref<256x8xf32, #tpu.memory_space<vmem>>, vector<256x8xf32>
    %c0_21 = arith.constant 0 : index
    %c0_22 = arith.constant 0 : index
    %38 = vector.load %arg6[%c0_21, %c0_22] : memref<8x256xf32, #tpu.memory_space<vmem>>, vector<8x256xf32>
    %cst_23 = arith.constant dense<0.000000e+00> : vector<256x256xf32>
    %39 = tpu.matmul %37, %38, %cst_23 {dimension_numbers = #tpu.dot_dimension_numbers<[1], [0], [0], [1], [0, 0, 1, 1], [], []>} : vector<256x8xf32>, vector<8x256xf32>, vector<256x256xf32> -> vector<256x256xf32>
    %40 = arith.addf %36, %39 : vector<256x256xf32>
    %c0_24 = arith.constant 0 : index
    %c0_25 = arith.constant 0 : index
    %41 = vector.load %arg7[%c0_24, %c0_25] : memref<1x256xf32, #tpu.memory_space<vmem>>, vector<1x256xf32>
    %42 = vector.broadcast %41 : vector<1x256xf32> to vector<256x256xf32>
    %43 = arith.addf %40, %42 : vector<256x256xf32>
    %cst_26 = arith.constant 0.000000e+00 : f32
    %44 = vector.broadcast %cst_26 : f32 to vector<256x256xf32>
    %45 = arith.maximumf %43, %44 : vector<256x256xf32>
    %c1_i32_27 = arith.constant 1 : i32
    %46 = tpu.memref_slice %arg14[%c1_i32_27] : memref<2x!tpu.dma_semaphore, #tpu.memory_space<semaphore_mem>> -> memref<1x!tpu.dma_semaphore, #tpu.memory_space<semaphore_mem>>
    %47 = tpu.memref_squeeze %46 : memref<1x!tpu.dma_semaphore, #tpu.memory_space<semaphore_mem>> -> memref<!tpu.dma_semaphore, #tpu.memory_space<semaphore_mem>>
    tpu.wait_dma2 semaphore(%47 : memref<!tpu.dma_semaphore, #tpu.memory_space<semaphore_mem>>) src(%arg10 : memref<256x128xf32, #tpu.memory_space<any>>) dst(%arg13 : memref<256x128xf32, #tpu.memory_space<vmem>>)
    %c0_28 = arith.constant 0 : index
    %c0_29 = arith.constant 0 : index
    %48 = vector.load %arg13[%c0_28, %c0_29] : memref<256x128xf32, #tpu.memory_space<vmem>>, vector<256x128xf32>
    %cst_30 = arith.constant dense<0.000000e+00> : vector<256x128xf32>
    %49 = tpu.matmul %45, %48, %cst_30 {dimension_numbers = #tpu.dot_dimension_numbers<[1], [0], [0], [1], [0, 0, 1, 1], [], []>} : vector<256x256xf32>, vector<256x128xf32>, vector<256x128xf32> -> vector<256x128xf32>
    %c0_31 = arith.constant 0 : index
    %c0_32 = arith.constant 0 : index
    %50 = vector.load %arg8[%c0_31, %c0_32] : memref<1x128xf32, #tpu.memory_space<vmem>>, vector<1x128xf32>
    %51 = vector.broadcast %50 : vector<1x128xf32> to vector<256x128xf32>
    %52 = arith.addf %49, %51 : vector<256x128xf32>
    %c0_33 = arith.constant 0 : index
    %c0_34 = arith.constant 0 : index
    %53 = vector.load %arg11[%c0_33, %c0_34] : memref<256x128xf32, #tpu.memory_space<vmem>>, vector<256x128xf32>
    tpu.vector_store %arg11[%c0_33, %c0_34], %52 {strides = array<i32>} : memref<256x128xf32, #tpu.memory_space<vmem>>, vector<256x128xf32>,
    return
  }
}

</mosaic_0001>

<bundles_post_ra>
// kernel: critic_forward.1
= control target key start
LH: loop header
LB: loop body
LE: loop exit
PB: predicated region body
PF: predicated region fallthrough
CT: control target
= control target key end

     0   :  { %s4078_s0 = inlined_call_operand.vmem [shape: f32[256,32], index: 0, kind: input, shape index: {}]   ;;  %s4079_s1 = inlined_call_operand.vmem [shape: f32[256,8], index: 1, kind: input, shape index: {}]   ;;  %s4080_s2 = inlined_call_operand.vmem [shape: f32[32,128], index: 2, kind: input, shape index: {}]   ;;  %s4081_s3 = inlined_call_operand.vmem [shape: f32[1,128], index: 3, kind: input, shape index: {}]   ;;  %s4082_s4 = inlined_call_operand.vmem [shape: f32[1,128], index: 4, kind: input, shape index: {}]   ;;  %s4083_s5 = inlined_call_operand.vmem [shape: f32[1,128], index: 5, kind: input, shape index: {}]   ;;  %s4084_s6 = inlined_call_operand.vmem [shape: f32[8,256], index: 6, kind: input, shape index: {}]   ;;  %s4085_s7 = inlined_call_operand.vmem [shape: f32[1,256], index: 7, kind: input, shape index: {}]   ;;  %s4086_s8 = inlined_call_operand.vmem [shape: f32[1,128], index: 8, kind: input, shape index: {}]   ;;  %s4087_s9 = inlined_call_operand.vmem [shape: f32[128,256], index: 9, kind: input, shape index: {}]   ;;  %s4088_s10 = inlined_call_operand.vmem [shape: f32[256,128], index: 10, kind: input, shape index: {}]   ;;  %s4089_s11 = inlined_call_operand.vmem [shape: f32[256,128], index: 11, kind: output, shape index: {}]  }
   0x1   :  { %v2400_v0 = vld [vmem:[%s4087_s9] sm:$0xff]  ;;  %v2405_v1 = vld [vmem:[%s4087_s9 + $0x8] sm:$0xff]  ;;  %v2410_v2 = vld [vmem:[%s4087_s9 + $0x10] sm:$0xff] }
   0x2   :  { %v2415_v3 = vld [vmem:[%s4087_s9 + $0x18] sm:$0xff]  ;;  %v2420_v4 = vld [vmem:[%s4087_s9 + $0x20] sm:$0xff]  ;;  %v2425_v5 = vld [vmem:[%s4087_s9 + $0x28] sm:$0xff] }
   0x3   :  { %v2430_v6 = vld [vmem:[%s4087_s9 + $0x30] sm:$0xff]  ;;  %v2435_v7 = vld [vmem:[%s4087_s9 + $0x38] sm:$0xff]  ;;  %v2440_v8 = vld [vmem:[%s4087_s9 + $0x40] sm:$0xff] }
   0x4   :  { %v2445_v9 = vld [vmem:[%s4087_s9 + $0x48] sm:$0xff]  ;;  %v2450_v10 = vld [vmem:[%s4087_s9 + $0x50] sm:$0xff]  ;;  %v2455_v11 = vld [vmem:[%s4087_s9 + $0x58] sm:$0xff] }
   0x5   :  { %v2460_v12 = vld [vmem:[%s4087_s9 + $0x60] sm:$0xff]  ;;  %v2465_v13 = vld [vmem:[%s4087_s9 + $0x68] sm:$0xff]  ;;  %v2470_v14 = vld [vmem:[%s4087_s9 + $0x70] sm:$0xff] }
   0x6   :  { %4105 = vst [vmem:[#allocation9_spill] sm:$0xff] %v2460_v12  ;;  %4106 = vst [vmem:[#allocation10_spill] sm:$0xff] %v2470_v14  ;;  %v2475_v15 = vld [vmem:[%s4087_s9 + $0x78] sm:$0xff]  ;;  %v2480_v16 = vld [vmem:[%s4087_s9 + $0x80] sm:$0xff] }
   0x7   :  { %4107 = vst [vmem:[#allocation11_spill] sm:$0xff] %v2480_v16  ;;  %v2485_v17 = vld [vmem:[%s4087_s9 + $0x88] sm:$0xff]  ;;  %v2490_v18 = vld [vmem:[%s4087_s9 + $0x90] sm:$0xff]  ;;  %v2495_v19 = vld [vmem:[%s4087_s9 + $0x98] sm:$0xff] }
   0x8   :  { %4108 = vst [vmem:[#allocation12_spill] sm:$0xff] %v2485_v17  ;;  %4109 = vst [vmem:[#allocation13_spill] sm:$0xff] %v2490_v18  ;;  %v2500_v20 = vld [vmem:[%s4087_s9 + $0xa0] sm:$0xff]  ;;  %v2505_v21 = vld [vmem:[%s4087_s9 + $0xa8] sm:$0xff] }
   0x9   :  { %4110 = vst [vmem:[#allocation14_spill] sm:$0xff] %v2495_v19  ;;  %4111 = vst [vmem:[#allocation15_spill] sm:$0xff] %v2500_v20  ;;  %v2510_v22 = vld [vmem:[%s4087_s9 + $0xb0] sm:$0xff]  ;;  %v2515_v23 = vld [vmem:[%s4087_s9 + $0xb8] sm:$0xff] }
   0xa   :  { %4112 = vst [vmem:[#allocation16_spill] sm:$0xff] %v2505_v21  ;;  %4113 = vst [vmem:[#allocation17_spill] sm:$0xff] %v2510_v22  ;;  %v2520_v24 = vld [vmem:[%s4087_s9 + $0xc0] sm:$0xff]  ;;  %v2525_v25 = vld [vmem:[%s4087_s9 + $0xc8] sm:$0xff] }
   0xb   :  { %4114 = vst [vmem:[#allocation18_spill] sm:$0xff] %v2515_v23  ;;  %4115 = vst [vmem:[#allocation19_spill] sm:$0xff] %v2520_v24  ;;  %v2530_v26 = vld [vmem:[%s4087_s9 + $0xd0] sm:$0xff]  ;;  %v2535_v27 = vld [vmem:[%s4087_s9 + $0xd8] sm:$0xff] }
   0xc   :  { %4116 = vst [vmem:[#allocation20_spill] sm:$0xff] %v2525_v25  ;;  %4117 = vst [vmem:[#allocation21_spill] sm:$0xff] %v2530_v26  ;;  %v2540_v28 = vld [vmem:[%s4087_s9 + $0xe0] sm:$0xff]  ;;  %v2545_v29 = vld [vmem:[%s4087_s9 + $0xe8] sm:$0xff] }
   0xd   :  { %4118 = vst [vmem:[#allocation22_spill] sm:$0xff] %v2535_v27  ;;  %4119 = vst [vmem:[#allocation23_spill] sm:$0xff] %v2540_v28  ;;  %v2550_v30 = vld [vmem:[%s4087_s9 + $0xf0] sm:$0xff]  ;;  %v2555_v31 = vld [vmem:[%s4087_s9 + $0xf8] sm:$0xff] }
   0xe   :  { %4120 = vst [vmem:[#allocation24_spill] sm:$0xff] %v2545_v29  ;;  %4121 = vst [vmem:[#allocation25_spill] sm:$0xff] %v2550_v30 }
   0xf   :  { %4122 = vst [vmem:[#allocation26_spill] sm:$0xff] %v2555_v31 }
  0x10   :  { %137 = vsyncadd [#allocation4], 4096  ;;  %v2560_v32 = vld [vmem:[%s4088_s10] sm:$0xff]  ;;  %v2565_v33 = vld [vmem:[%s4088_s10 + $0x8] sm:$0xff] }
  0x11   :  { %4123 = vst [vmem:[#allocation27_spill] sm:$0xff] %v2560_v32  ;;  %4124 = vst [vmem:[#allocation28_spill] sm:$0xff] %v2565_v33  ;;  %v2570_v34 = vld [vmem:[%s4088_s10 + $0x10] sm:$0xff]  ;;  %v2575_v35 = vld [vmem:[%s4088_s10 + $0x18] sm:$0xff] }
  0x12   :  { %4125 = vst [vmem:[#allocation29_spill] sm:$0xff] %v2570_v34  ;;  %4126 = vst [vmem:[#allocation30_spill] sm:$0xff] %v2575_v35  ;;  %v2580_v36 = vld [vmem:[%s4088_s10 + $0x20] sm:$0xff]  ;;  %v2585_v37 = vld [vmem:[%s4088_s10 + $0x28] sm:$0xff] }
  0x13   :  { %4127 = vst [vmem:[#allocation31_spill] sm:$0xff] %v2580_v36  ;;  %4128 = vst [vmem:[#allocation32_spill] sm:$0xff] %v2585_v37  ;;  %v2590_v38 = vld [vmem:[%s4088_s10 + $0x30] sm:$0xff]  ;;  %v2595_v39 = vld [vmem:[%s4088_s10 + $0x38] sm:$0xff] }
  0x14   :  { %4129 = vst [vmem:[#allocation33_spill] sm:$0xff] %v2590_v38  ;;  %4130 = vst [vmem:[#allocation34_spill] sm:$0xff] %v2595_v39  ;;  %v2600_v40 = vld [vmem:[%s4088_s10 + $0x40] sm:$0xff]  ;;  %v2605_v41 = vld [vmem:[%s4088_s10 + $0x48] sm:$0xff] }
  0x15   :  { %4131 = vst [vmem:[#allocation35_spill] sm:$0xff] %v2600_v40  ;;  %4132 = vst [vmem:[#allocation36_spill] sm:$0xff] %v2605_v41  ;;  %v2610_v42 = vld [vmem:[%s4088_s10 + $0x50] sm:$0xff]  ;;  %v2615_v43 = vld [vmem:[%s4088_s10 + $0x58] sm:$0xff] }
  0x16   :  { %4133 = vst [vmem:[#allocation37_spill] sm:$0xff] %v2610_v42  ;;  %4134 = vst [vmem:[#allocation38_spill] sm:$0xff] %v2615_v43  ;;  %v2620_v44 = vld [vmem:[%s4088_s10 + $0x60] sm:$0xff]  ;;  %v2625_v45 = vld [vmem:[%s4088_s10 + $0x68] sm:$0xff] }
  0x17   :  { %4135 = vst [vmem:[#allocation39_spill] sm:$0xff] %v2620_v44  ;;  %4136 = vst [vmem:[#allocation40_spill] sm:$0xff] %v2625_v45  ;;  %v2630_v46 = vld [vmem:[%s4088_s10 + $0x70] sm:$0xff]  ;;  %v2635_v47 = vld [vmem:[%s4088_s10 + $0x78] sm:$0xff] }
  0x18   :  { %4137 = vst [vmem:[#allocation41_spill] sm:$0xff] %v2630_v46  ;;  %4138 = vst [vmem:[#allocation42_spill] sm:$0xff] %v2635_v47  ;;  %v2640_v48 = vld [vmem:[%s4088_s10 + $0x80] sm:$0xff]  ;;  %v2645_v49 = vld [vmem:[%s4088_s10 + $0x88] sm:$0xff] }
  0x19   :  { %4139 = vst [vmem:[#allocation43_spill] sm:$0xff] %v2640_v48  ;;  %4140 = vst [vmem:[#allocation44_spill] sm:$0xff] %v2645_v49  ;;  %v2650_v50 = vld [vmem:[%s4088_s10 + $0x90] sm:$0xff]  ;;  %v2655_v51 = vld [vmem:[%s4088_s10 + $0x98] sm:$0xff] }
  0x1a   :  { %4141 = vst [vmem:[#allocation45_spill] sm:$0xff] %v2650_v50  ;;  %4142 = vst [vmem:[#allocation46_spill] sm:$0xff] %v2655_v51  ;;  %v2660_v52 = vld [vmem:[%s4088_s10 + $0xa0] sm:$0xff]  ;;  %v2665_v53 = vld [vmem:[%s4088_s10 + $0xa8] sm:$0xff] }
  0x1b   :  { %4143 = vst [vmem:[#allocation47_spill] sm:$0xff] %v2660_v52  ;;  %4144 = vst [vmem:[#allocation48_spill] sm:$0xff] %v2665_v53  ;;  %v2670_v54 = vld [vmem:[%s4088_s10 + $0xb0] sm:$0xff]  ;;  %v2675_v55 = vld [vmem:[%s4088_s10 + $0xb8] sm:$0xff] }
  0x1c   :  { %4145 = vst [vmem:[#allocation49_spill] sm:$0xff] %v2670_v54  ;;  %4146 = vst [vmem:[#allocation50_spill] sm:$0xff] %v2675_v55  ;;  %v2680_v56 = vld [vmem:[%s4088_s10 + $0xc0] sm:$0xff]  ;;  %v2685_v57 = vld [vmem:[%s4088_s10 + $0xc8] sm:$0xff] }
  0x1d   :  { %4147 = vst [vmem:[#allocation51_spill] sm:$0xff] %v2680_v56  ;;  %4148 = vst [vmem:[#allocation52_spill] sm:$0xff] %v2685_v57  ;;  %v2690_v58 = vld [vmem:[%s4088_s10 + $0xd0] sm:$0xff]  ;;  %v2695_v59 = vld [vmem:[%s4088_s10 + $0xd8] sm:$0xff] }
  0x1e   :  { %4149 = vst [vmem:[#allocation53_spill] sm:$0xff] %v2690_v58  ;;  %4150 = vst [vmem:[#allocation54_spill] sm:$0xff] %v2695_v59  ;;  %v2700_v60 = vld [vmem:[%s4088_s10 + $0xe0] sm:$0xff]  ;;  %v2705_v61 = vld [vmem:[%s4088_s10 + $0xe8] sm:$0xff] }
  0x1f   :  { %4151 = vst [vmem:[#allocation55_spill] sm:$0xff] %v2700_v60  ;;  %4152 = vst [vmem:[#allocation56_spill] sm:$0xff] %v2705_v61  ;;  %v2710_v62 = vld [vmem:[%s4088_s10 + $0xf0] sm:$0xff]  ;;  %v2715_v63 = vld [vmem:[%s4088_s10 + $0xf8] sm:$0xff] }
  0x20   :  { %4153 = vst [vmem:[#allocation57_spill] sm:$0xff] %v2710_v62  ;;  %4154 = vst [vmem:[#allocation58_spill] sm:$0xff] %v2715_v63 }
  0x21   :  { %242 = vsyncadd [#allocation4 + $0x1], 4096  ;;  %v275_v60 = vld [vmem:[%s4080_s2] sm:$0xff]  ;;  %v276_v59 = vld [vmem:[%s4080_s2 + $0x8] sm:$0xff]  ;;  %vm286_vm0 = vcmask 261120   ;;  %v753_v12 = vlaneseq }
  0x22   :  { %v2175_v61 = vpack.c.bf16 %v276_v59, %v275_v60  ;;  %v277_v62 = vld [vmem:[%s4080_s2 + $0x10] sm:$0xff]  ;;  %v278_v58 = vld [vmem:[%s4080_s2 + $0x18] sm:$0xff]  ;;  %v243_v63 = vld [vmem:[%s4078_s0] sm:$0xff] }
  0x23   :  { %v2179_v57 = vpack.c.bf16 %v278_v58, %v277_v62  ;;  %2127 = vmatprep.mubr.msk.f32.mxu0 %vm286_vm0, %v243_v63  ;;  %v244_v59 = vld [vmem:[%s4078_s0 + $0x8] sm:$0xff]  ;;  %v245_v60 = vld [vmem:[%s4078_s0 + $0x10] sm:$0xff]  ;;  %v246_v58 = vld [vmem:[%s4078_s0 + $0x18] sm:$0xff] }
  0x24   :  { %2176 = vmatprep.subr.bf16.mxu0 %v2175_v61  ;;  %v249_v62 = vld [vmem:[%s4078_s0 + $0x30] sm:$0xff]  ;;  %v250_v63 = vld [vmem:[%s4078_s0 + $0x38] sm:$0xff] }
  0x25   :  { %2178 = vmatpush3.bf16.msra.mxu0 %v2175_v61  ;;  %v248_v61 = vld [vmem:[%s4078_s0 + $0x28] sm:$0xff] }
  0x26   :  { %2180 = vmatprep.subr.bf16.mxu0 %v2179_v57 }
  0x29   :  { %2182 = vmatpush3.bf16.msra.mxu0 %v2179_v57  ;;  %v247_v57 = vld [vmem:[%s4078_s0 + $0x20] sm:$0xff] }
  0x2c   :  { %2128 = vmatmul.mubr.msk.f32.vlgmr.msra.gmra.mrb[0].mxu0 %vm286_vm0, %v244_v59  ;;  %v251_v59 = vld [vmem:[%s4078_s0 + $0x40] sm:$0xff] }
  0x2d   :  { %2130 = vmatprep.mubr.msk.f32.mxu0 %vm286_vm0, %v245_v60  ;;  %v252_v60 = vld [vmem:[%s4078_s0 + $0x48] sm:$0xff] }
  0x30   :  { %2131 = vmatmul.mubr.msk.f32.gmra.mrb[2].mxu0 %vm286_vm0, %v246_v58  ;;  %v253_v58 = vld [vmem:[%s4078_s0 + $0x50] sm:$0xff] }
  0x31   :  { %2133 = vmatprep.mubr.msk.f32.mxu0 %vm286_vm0, %v247_v57  ;;  %v254_v57 = vld [vmem:[%s4078_s0 + $0x58] sm:$0xff] }
  0x34   :  { %2134 = vmatmul.mubr.msk.f32.gmra.mrb[4].mxu0 %vm286_vm0, %v248_v61  ;;  %v255_v61 = vld [vmem:[%s4078_s0 + $0x60] sm:$0xff] }
  0x35   :  { %2136 = vmatprep.mubr.msk.f32.mxu0 %vm286_vm0, %v249_v62  ;;  %v256_v62 = vld [vmem:[%s4078_s0 + $0x68] sm:$0xff] }
  0x38   :  { %2137 = vmatmul.mubr.msk.f32.gmra.mrb[6].mxu0 %vm286_vm0, %v250_v63  ;;  %v257_v63 = vld [vmem:[%s4078_s0 + $0x70] sm:$0xff] }
  0x39   :  { %2139 = vmatprep.mubr.msk.f32.mxu0 %vm286_vm0, %v251_v59  ;;  %v258_v59 = vld [vmem:[%s4078_s0 + $0x78] sm:$0xff] }
  0x3c   :  { %2140 = vmatmul.mubr.msk.f32.gmra.mrb[8].mxu0 %vm286_vm0, %v252_v60  ;;  %v259_v60 = vld [vmem:[%s4078_s0 + $0x80] sm:$0xff] }
  0x3d   :  { %2142 = vmatprep.mubr.msk.f32.mxu0 %vm286_vm0, %v253_v58  ;;  %v260_v58 = vld [vmem:[%s4078_s0 + $0x88] sm:$0xff] }
  0x40   :  { %2143 = vmatmul.mubr.msk.f32.gmra.mrb[10].mxu0 %vm286_vm0, %v254_v57  ;;  %v261_v57 = vld [vmem:[%s4078_s0 + $0x90] sm:$0xff] }
  0x41   :  { %2145 = vmatprep.mubr.msk.f32.mxu0 %vm286_vm0, %v255_v61  ;;  %v262_v61 = vld [vmem:[%s4078_s0 + $0x98] sm:$0xff] }
  0x44   :  { %2146 = vmatmul.mubr.msk.f32.gmra.mrb[12].mxu0 %vm286_vm0, %v256_v62  ;;  %v263_v62 = vld [vmem:[%s4078_s0 + $0xa0] sm:$0xff] }
  0x45   :  { %2148 = vmatprep.mubr.msk.f32.mxu0 %vm286_vm0, %v257_v63  ;;  %v264_v63 = vld [vmem:[%s4078_s0 + $0xa8] sm:$0xff] }
  0x48   :  { %2149 = vmatmul.mubr.msk.f32.gmra.mrb[14].mxu0 %vm286_vm0, %v258_v59  ;;  %v265_v59 = vld [vmem:[%s4078_s0 + $0xb0] sm:$0xff] }
  0x49   :  { %2151 = vmatprep.mubr.msk.f32.mxu0 %vm286_vm0, %v259_v60  ;;  %v266_v60 = vld [vmem:[%s4078_s0 + $0xb8] sm:$0xff] }
  0x4c   :  { %2152 = vmatmul.mubr.msk.f32.gmra.mrb[16].mxu0 %vm286_vm0, %v260_v58  ;;  %v267_v58 = vld [vmem:[%s4078_s0 + $0xc0] sm:$0xff] }
  0x4d   :  { %2154 = vmatprep.mubr.msk.f32.mxu0 %vm286_vm0, %v261_v57  ;;  %v268_v57 = vld [vmem:[%s4078_s0 + $0xc8] sm:$0xff] }
  0x50   :  { %2155 = vmatmul.mubr.msk.f32.gmra.mrb[18].mxu0 %vm286_vm0, %v262_v61  ;;  %v269_v61 = vld [vmem:[%s4078_s0 + $0xd0] sm:$0xff] }
  0x51   :  { %2157 = vmatprep.mubr.msk.f32.mxu0 %vm286_vm0, %v263_v62  ;;  %v270_v62 = vld [vmem:[%s4078_s0 + $0xd8] sm:$0xff] }
  0x54   :  { %2158 = vmatmul.mubr.msk.f32.gmra.mrb[20].mxu0 %vm286_vm0, %v264_v63  ;;  %v271_v63 = vld [vmem:[%s4078_s0 + $0xe0] sm:$0xff] }
  0x55   :  { %2160 = vmatprep.mubr.msk.f32.mxu0 %vm286_vm0, %v265_v59  ;;  %v272_v59 = vld [vmem:[%s4078_s0 + $0xe8] sm:$0xff] }
  0x58   :  { %2161 = vmatmul.mubr.msk.f32.gmra.mrb[22].mxu0 %vm286_vm0, %v266_v60  ;;  %v273_v60 = vld [vmem:[%s4078_s0 + $0xf0] sm:$0xff] }
  0x59   :  { %2163 = vmatprep.mubr.msk.f32.mxu0 %vm286_vm0, %v267_v58  ;;  %v274_v58 = vld [vmem:[%s4078_s0 + $0xf8] sm:$0xff] }
  0x5c   :  { %2164 = vmatmul.mubr.msk.f32.gmra.mrb[24].mxu0 %vm286_vm0, %v268_v57  ;;  %v2860_v57 = vld [vmem:[%s4081_s3] ss:$0 sm:$0xff] }
  0x5d   :  { %2166 = vmatprep.mubr.msk.f32.mxu0 %vm286_vm0, %v269_v61 }
  0x60   :  { %2167 = vmatmul.mubr.msk.f32.gmra.mrb[26].mxu0 %vm286_vm0, %v270_v62 }
  0x61   :  { %2169 = vmatprep.mubr.msk.f32.mxu0 %vm286_vm0, %v271_v63 }
  0x64   :  { %2170 = vmatmul.mubr.msk.f32.gmra.mrb[28].mxu0 %vm286_vm0, %v272_v59 }
  0x65   :  { %2172 = vmatprep.mubr.msk.f32.mxu0 %vm286_vm0, %v273_v60 }
  0x68   :  { %2173 = vmatmul.mubr.msk.f32.gmra.mrb[30].mxu0 %vm286_vm0, %v274_v58 }
  0xff   :  { %v2129_v61 = vpop.f32.mrb[0].mxu0 }
 0x100   :  { %v449_v62 = vpop.f32.mrb[1].mxu0  ;;  %v2863_v63 = vadd.f32 %v2129_v61, %v2860_v57 }
 0x101   :  { %v2866_v59 = vadd.f32 %v2860_v57, %v449_v62 }
 0x103   :  { %v2132_v60 = vpop.f32.mrb[2].mxu0  ;;  %v608_v55 = vadd.f32 %v2863_v63, %v2866_v59 }
 0x104   :  { %v459_v56 = vpop.f32.mrb[3].mxu0  ;;  %v2874_v54 = vadd.f32 %v2132_v60, %v2860_v57 }
 0x105   :  { %v2871_v58 = vadd.f32 %v2860_v57, %v459_v56 }
 0x107   :  { %v609_v53 = vadd.f32 %v608_v55, %v2871_v58  ;;  %v2135_v52 = vpop.f32.mrb[4].mxu0 }
 0x108   :  { %v469_v51 = vpop.f32.mrb[5].mxu0  ;;  %v2882_v50 = vadd.f32 %v2135_v52, %v2860_v57 }
 0x109   :  { %v2878_v61 = vadd.f32 %v2860_v57, %v469_v51  ;;  %v610_v62 = vadd.f32 %v609_v53, %v2874_v54 }
 0x10b   :  { %v611_v49 = vadd.f32 %v610_v62, %v2878_v61  ;;  %v2138_v48 = vpop.f32.mrb[6].mxu0 }
 0x10c   :  { %v479_v56 = vpop.f32.mrb[7].mxu0  ;;  %v2890_v55 = vadd.f32 %v2138_v48, %v2860_v57 }
 0x10d   :  { %v2886_v47 = vadd.f32 %v2860_v57, %v479_v56  ;;  %v612_v60 = vadd.f32 %v611_v49, %v2882_v50 }
 0x10f   :  { %v613_v51 = vadd.f32 %v612_v60, %v2886_v47  ;;  %v2141_v46 = vpop.f32.mrb[8].mxu0 }
 0x110   :  { %v489_v45 = vpop.f32.mrb[9].mxu0  ;;  %v2898_v62 = vadd.f32 %v2141_v46, %v2860_v57 }
 0x111   :  { %v2894_v53 = vadd.f32 %v2860_v57, %v489_v45  ;;  %v614_v52 = vadd.f32 %v613_v51, %v2890_v55 }
 0x113   :  { %v615_v56 = vadd.f32 %v614_v52, %v2894_v53  ;;  %v2144_v44 = vpop.f32.mrb[10].mxu0 }
 0x114   :  { %v499_v43 = vpop.f32.mrb[11].mxu0  ;;  %v2906_v60 = vadd.f32 %v2144_v44, %v2860_v57 }
 0x115   :  { %v2902_v49 = vadd.f32 %v2860_v57, %v499_v43  ;;  %v616_v48 = vadd.f32 %v615_v56, %v2898_v62 }
 0x117   :  { %v617_v45 = vadd.f32 %v616_v48, %v2902_v49  ;;  %v2147_v42 = vpop.f32.mrb[12].mxu0 }
 0x118   :  { %v509_v41 = vpop.f32.mrb[13].mxu0  ;;  %v2914_v52 = vadd.f32 %v2147_v42, %v2860_v57 }
 0x119   :  { %v2910_v51 = vadd.f32 %v2860_v57, %v509_v41  ;;  %v618_v46 = vadd.f32 %v617_v45, %v2906_v60 }
 0x11b   :  { %v619_v43 = vadd.f32 %v618_v46, %v2910_v51  ;;  %v2150_v40 = vpop.f32.mrb[14].mxu0 }
 0x11c   :  { %v519_v39 = vpop.f32.mrb[15].mxu0  ;;  %v2922_v48 = vadd.f32 %v2150_v40, %v2860_v57 }
 0x11d   :  { %v2918_v56 = vadd.f32 %v2860_v57, %v519_v39  ;;  %v620_v44 = vadd.f32 %v619_v43, %v2914_v52 }
 0x11f   :  { %v621_v41 = vadd.f32 %v620_v44, %v2918_v56  ;;  %v2153_v38 = vpop.f32.mrb[16].mxu0 }
 0x120   :  { %v529_v37 = vpop.f32.mrb[17].mxu0  ;;  %v535_v46 = vadd.f32 %v2153_v38, %v2860_v57 }
 0x121   :  { %v530_v45 = vadd.f32 %v2860_v57, %v529_v37  ;;  %v622_v42 = vadd.f32 %v621_v41, %v2922_v48 }
 0x123   :  { %v623_v36 = vadd.f32 %v622_v42, %v530_v45  ;;  %v2156_v35 = vpop.f32.mrb[18].mxu0 }
 0x124   :  { %v539_v34 = vpop.f32.mrb[19].mxu0  ;;  %v545_v43 = vadd.f32 %v2156_v35, %v2860_v57 }
 0x125   :  { %v540_v39 = vadd.f32 %v2860_v57, %v539_v34  ;;  %v624_v33 = vadd.f32 %v623_v36, %v535_v46 }
 0x127   :  { %v625_v40 = vadd.f32 %v624_v33, %v540_v39  ;;  %v2159_v32 = vpop.f32.mrb[20].mxu0 }
 0x128   :  { %v549_v30 = vpop.f32.mrb[21].mxu0  ;;  %v555_v37 = vadd.f32 %v2159_v32, %v2860_v57 }
 0x129   :  { %v550_v44 = vadd.f32 %v2860_v57, %v549_v30  ;;  %v626_v28 = vadd.f32 %v625_v40, %v545_v43 }
 0x12b   :  { %v627_v31 = vadd.f32 %v626_v28, %v550_v44  ;;  %v2162_v41 = vpop.f32.mrb[22].mxu0 }
 0x12c   :  { %v559_v29 = vpop.f32.mrb[23].mxu0  ;;  %v565_v26 = vadd.f32 %v2162_v41, %v2860_v57 }
 0x12d   :  { %v560_v38 = vadd.f32 %v2860_v57, %v559_v29  ;;  %v628_v42 = vadd.f32 %v627_v31, %v555_v37 }
 0x12f   :  { %v629_v34 = vadd.f32 %v628_v42, %v560_v38  ;;  %v2165_v36 = vpop.f32.mrb[24].mxu0 }
 0x130   :  { %v569_v24 = vpop.f32.mrb[25].mxu0  ;;  %v575_v27 = vadd.f32 %v2165_v36, %v2860_v57 }
 0x131   :  { %v570_v33 = vadd.f32 %v2860_v57, %v569_v24  ;;  %v630_v35 = vadd.f32 %v629_v34, %v565_v26 }
 0x133   :  { %v631_v30 = vadd.f32 %v630_v35, %v570_v33  ;;  %v2168_v40 = vpop.f32.mrb[26].mxu0 }
 0x134   :  { %v579_v25 = vpop.f32.mrb[27].mxu0  ;;  %v585_v22 = vadd.f32 %v2168_v40, %v2860_v57 }
 0x135   :  { %v580_v28 = vadd.f32 %v2860_v57, %v579_v25  ;;  %v632_v32 = vadd.f32 %v631_v30, %v575_v27 }
 0x137   :  { %v633_v29 = vadd.f32 %v632_v32, %v580_v28  ;;  %v2171_v31 = vpop.f32.mrb[28].mxu0 }
 0x138   :  { %v589_v20 = vpop.f32.mrb[29].mxu0  ;;  %v595_v23 = vadd.f32 %v2171_v31, %v2860_v57 }
 0x139   :  { %v590_v41 = vadd.f32 %v2860_v57, %v589_v20  ;;  %v634_v42 = vadd.f32 %v633_v29, %v585_v22 }
 0x13b   :  { %v635_v24 = vadd.f32 %v634_v42, %v590_v41  ;;  %v2174_v34 = vpop.f32.mrb[30].mxu0 }
 0x13c   :  { %v599_v21 = vpop.f32.mrb[31].mxu0  ;;  %v605_v18 = vadd.f32 %v2174_v34, %v2860_v57 }
 0x13d   :  { %v600_v36 = vadd.f32 %v2860_v57, %v599_v21  ;;  %v636_v35 = vadd.f32 %v635_v24, %v595_v23 }
 0x13f   :  { %v637_v25 = vadd.f32 %v636_v35, %v600_v36 }
 0x141   :  { %v638_v30 = vadd.f32 %v637_v25, %v605_v18 }
 0x143   :  { %v639_v16 = vrot.slane %v638_v30, 4 }
 0x145   :  { %v640_v40 = vadd.f32 %v639_v16, %v638_v30 }
 0x147   :  { %v641_v32 = vrot.slane %v640_v40, 2 }
 0x149   :  { %v642_v19 = vadd.f32 %v641_v32, %v640_v40 }
 0x14b   :  { %v643_v17 = vrot.slane %v642_v19, 1 }
 0x14d   :  { %v644_v14 = vadd.f32 %v643_v17, %v642_v19 }
 0x14f   :  { %v645_v20 = vmul.f32 0.00390625, %v644_v14 }
 0x151   :  { %v2943_v29 = vsub.f32 %v2894_v53, %v645_v20  ;;  %v2946_v31 = vsub.f32 %v2898_v62, %v645_v20  ;;  %v2949_v21 = vsub.f32 %v2902_v49, %v645_v20  ;;  %v2952_v57 = vsub.f32 %v2906_v60, %v645_v20 }
 0x152   :  { %v2955_v42 = vsub.f32 %v2910_v51, %v645_v20  ;;  %v2958_v16 = vsub.f32 %v2914_v52, %v645_v20  ;;  %v2961_v14 = vsub.f32 %v2918_v56, %v645_v20  ;;  %v2964_v17 = vsub.f32 %v2922_v48, %v645_v20 }
 0x153   :  { %v2966_v19 = vsub.f32 %v530_v45, %v645_v20  ;;  %v2968_v53 = vsub.f32 %v535_v46, %v645_v20  ;;  %v2970_v62 = vsub.f32 %v540_v39, %v645_v20  ;;  %v2972_v49 = vsub.f32 %v545_v43, %v645_v20 }
 0x154   :  { %v2974_v60 = vsub.f32 %v550_v44, %v645_v20  ;;  %v2976_v51 = vsub.f32 %v555_v37, %v645_v20  ;;  %v2978_v52 = vsub.f32 %v560_v38, %v645_v20  ;;  %v2980_v24 = vsub.f32 %v565_v26, %v645_v20 }
 0x155   :  { %v2982_v56 = vsub.f32 %v570_v33, %v645_v20  ;;  %v2984_v48 = vsub.f32 %v575_v27, %v645_v20  ;;  %v2986_v45 = vsub.f32 %v580_v28, %v645_v20  ;;  %v2988_v46 = vsub.f32 %v585_v22, %v645_v20 }
 0x156   :  { %v2990_v39 = vsub.f32 %v590_v41, %v645_v20  ;;  %v2992_v43 = vsub.f32 %v595_v23, %v645_v20  ;;  %v2994_v44 = vsub.f32 %v600_v36, %v645_v20  ;;  %v2996_v37 = vsub.f32 %v605_v18, %v645_v20 }
 0x157   :  { %v2999_v38 = vsub.f32 %v2866_v59, %v645_v20  ;;  %v3002_v26 = vsub.f32 %v2863_v63, %v645_v20  ;;  %v3005_v27 = vsub.f32 %v2871_v58, %v645_v20  ;;  %v3012_v33 = vsub.f32 %v2874_v54, %v645_v20 }
 0x158   :  { %v3015_v18 = vsub.f32 %v2878_v61, %v645_v20  ;;  %v3020_v28 = vsub.f32 %v2882_v50, %v645_v20  ;;  %v3025_v34 = vsub.f32 %v2886_v47, %v645_v20  ;;  %v3030_v61 = vsub.f32 %v2890_v55, %v645_v20 }
 0x159   :  { %v678_v22 = vmul.f32 %v2999_v38, %v2999_v38  ;;  %v679_v23 = vmul.f32 %v3002_v26, %v3002_v26  ;;  %v680_v59 = vmul.f32 %v3005_v27, %v3005_v27  ;;  %v681_v58 = vmul.f32 %v3012_v33, %v3012_v33 }
 0x15a   :  { %v682_v54 = vmul.f32 %v3015_v18, %v3015_v18  ;;  %v683_v35 = vmul.f32 %v3020_v28, %v3020_v28  ;;  %v684_v50 = vmul.f32 %v3025_v34, %v3025_v34  ;;  %v685_v40 = vmul.f32 %v3030_v61, %v3030_v61 }
 0x15b   :  { %v710_v63 = vadd.f32 %v679_v23, %v678_v22  ;;  %v686_v32 = vmul.f32 %v2943_v29, %v2943_v29  ;;  %v687_v55 = vmul.f32 %v2946_v31, %v2946_v31  ;;  %v688_v23 = vmul.f32 %v2949_v21, %v2949_v21 }
 0x15d   :  { %v711_v41 = vadd.f32 %v710_v63, %v680_v59  ;;  %v689_v63 = vmul.f32 %v2952_v57, %v2952_v57 }
 0x15f   :  { %v712_v36 = vadd.f32 %v711_v41, %v681_v58  ;;  %v690_v41 = vmul.f32 %v2955_v42, %v2955_v42 }
 0x161   :  { %v713_v25 = vadd.f32 %v712_v36, %v682_v54  ;;  %v691_v36 = vmul.f32 %v2958_v16, %v2958_v16 }
 0x163   :  { %v714_v30 = vadd.f32 %v713_v25, %v683_v35  ;;  %v692_v25 = vmul.f32 %v2961_v14, %v2961_v14 }
 0x165   :  { %v715_v47 = vadd.f32 %v714_v30, %v684_v50  ;;  %v693_v30 = vmul.f32 %v2964_v17, %v2964_v17 }
 0x167   :  { %v716_v22 = vadd.f32 %v715_v47, %v685_v40  ;;  %v694_v47 = vmul.f32 %v2966_v19, %v2966_v19 }
 0x169   :  { %v717_v20 = vadd.f32 %v716_v22, %v686_v32  ;;  %v695_v22 = vmul.f32 %v2968_v53, %v2968_v53 }
 0x16b   :  { %v718_v59 = vadd.f32 %v717_v20, %v687_v55  ;;  %v696_v20 = vmul.f32 %v2970_v62, %v2970_v62 }
 0x16d   :  { %v719_v58 = vadd.f32 %v718_v59, %v688_v23  ;;  %v697_v59 = vmul.f32 %v2972_v49, %v2972_v49 }
 0x16f   :  { %v720_v54 = vadd.f32 %v719_v58, %v689_v63  ;;  %v698_v58 = vmul.f32 %v2974_v60, %v2974_v60 }
 0x171   :  { %v721_v35 = vadd.f32 %v720_v54, %v690_v41  ;;  %v699_v54 = vmul.f32 %v2976_v51, %v2976_v51 }
 0x173   :  { %v722_v50 = vadd.f32 %v721_v35, %v691_v36  ;;  %v700_v35 = vmul.f32 %v2978_v52, %v2978_v52 }
 0x175   :  { %v723_v40 = vadd.f32 %v722_v50, %v692_v25  ;;  %v701_v50 = vmul.f32 %v2980_v24, %v2980_v24 }
 0x177   :  { %v724_v32 = vadd.f32 %v723_v40, %v693_v30  ;;  %v702_v40 = vmul.f32 %v2982_v56, %v2982_v56 }
 0x179   :  { %v725_v55 = vadd.f32 %v724_v32, %v694_v47  ;;  %v703_v32 = vmul.f32 %v2984_v48, %v2984_v48 }
 0x17b   :  { %v726_v23 = vadd.f32 %v725_v55, %v695_v22  ;;  %v704_v55 = vmul.f32 %v2986_v45, %v2986_v45 }
 0x17d   :  { %v727_v63 = vadd.f32 %v726_v23, %v696_v20  ;;  %v705_v23 = vmul.f32 %v2988_v46, %v2988_v46 }
 0x17f   :  { %v728_v41 = vadd.f32 %v727_v63, %v697_v59  ;;  %v706_v63 = vmul.f32 %v2990_v39, %v2990_v39 }
 0x181   :  { %v729_v36 = vadd.f32 %v728_v41, %v698_v58  ;;  %v707_v41 = vmul.f32 %v2992_v43, %v2992_v43 }
 0x183   :  { %v730_v25 = vadd.f32 %v729_v36, %v699_v54  ;;  %v708_v36 = vmul.f32 %v2994_v44, %v2994_v44 }
 0x185   :  { %v731_v30 = vadd.f32 %v730_v25, %v700_v35  ;;  %v709_v25 = vmul.f32 %v2996_v37, %v2996_v37 }
 0x187   :  { %v732_v47 = vadd.f32 %v731_v30, %v701_v50 }
 0x189   :  { %v733_v22 = vadd.f32 %v732_v47, %v702_v40 }
 0x18b   :  { %v734_v20 = vadd.f32 %v733_v22, %v703_v32 }
 0x18d   :  { %v735_v59 = vadd.f32 %v734_v20, %v704_v55 }
 0x18f   :  { %v736_v58 = vadd.f32 %v735_v59, %v705_v23 }
 0x191   :  { %v737_v54 = vadd.f32 %v736_v58, %v706_v63  ;;  %v3086_v63 = vshrl.u32 %v753_v12, 7  ;;  %v748_v58 = vld [vmem:[%s4082_s4] sm:$0x1] }
 0x193   :  { %v738_v35 = vadd.f32 %v737_v54, %v707_v41  ;;  %v4090_v41 = vsub.s32 0, %v3086_v63 }
 0x195   :  { %v739_v50 = vadd.f32 %v738_v35, %v708_v36 }
 0x197   :  { %v740_v30 = vadd.f32 %v739_v50, %v709_v25 }
 0x199   :  { %v741_v40 = vrot.slane %v740_v30, 4 }
 0x19b   :  { %v742_v47 = vadd.f32 %v741_v40, %v740_v30 }
 0x19d   :  { %v743_v32 = vrot.slane %v742_v47, 2 }
 0x19f   :  { %v744_v22 = vadd.f32 %v743_v32, %v742_v47 }
 0x1a1   :  { %v745_v55 = vrot.slane %v744_v22, 1 }
 0x1a3   :  { %v746_v20 = vadd.f32 %v745_v55, %v744_v22 }
 0x1a5   :  { %v747_v23 = vmul.f32 0.00390625, %v746_v20 }
 0x1a7   :  { %v749_v59 = vadd.f32 1e-05, %v747_v23 }
 0x1a9   :  { %2329 = vrsqrt.f32 %v749_v59 }
 0x1b3   :  { %v2330_v54 = vpop.eup %2329 }
 0x1b4   :  { %v751_v36 = vmul.f32 %v2330_v54, %v748_v58 }
 0x1b6   :  { %v756_v35 = vrot.slane %v751_v36, %v4090_v41 }
 0x1b8   :  { %v758_v25 = vmul.f32 %v756_v35, %v2999_v38  ;;  %v759_v50 = vmul.f32 %v756_v35, %v3002_v26  ;;  %v760_v30 = vmul.f32 %v756_v35, %v3005_v27  ;;  %v761_v12 = vmul.f32 %v756_v35, %v3012_v33 }
 0x1b9   :  { %v762_v40 = vmul.f32 %v756_v35, %v3015_v18  ;;  %v763_v47 = vmul.f32 %v756_v35, %v3020_v28  ;;  %v764_v32 = vmul.f32 %v756_v35, %v3025_v34  ;;  %v765_v22 = vmul.f32 %v756_v35, %v3030_v61 }
 0x1ba   :  { %v766_v55 = vmul.f32 %v756_v35, %v2943_v29  ;;  %v767_v20 = vmul.f32 %v756_v35, %v2946_v31  ;;  %v768_v38 = vmul.f32 %v756_v35, %v2949_v21  ;;  %v769_v26 = vmul.f32 %v756_v35, %v2952_v57 }
 0x1bb   :  { %v770_v27 = vmul.f32 %v756_v35, %v2955_v42  ;;  %v771_v33 = vmul.f32 %v756_v35, %v2958_v16  ;;  %v772_v18 = vmul.f32 %v756_v35, %v2961_v14  ;;  %v773_v28 = vmul.f32 %v756_v35, %v2964_v17  ;;  %v2047_v14 = vld [vmem:[%s4083_s5] ss:$0 sm:$0xff] }
 0x1bc   :  { %v774_v34 = vmul.f32 %v756_v35, %v2966_v19  ;;  %v775_v61 = vmul.f32 %v756_v35, %v2968_v53  ;;  %v776_v29 = vmul.f32 %v756_v35, %v2970_v62  ;;  %v777_v31 = vmul.f32 %v756_v35, %v2972_v49 }
 0x1bd   :  { %v778_v21 = vmul.f32 %v756_v35, %v2974_v60  ;;  %v779_v57 = vmul.f32 %v756_v35, %v2976_v51  ;;  %v780_v42 = vmul.f32 %v756_v35, %v2978_v52  ;;  %v781_v16 = vmul.f32 %v756_v35, %v2980_v24 }
 0x1be   :  { %v782_v17 = vmul.f32 %v756_v35, %v2982_v56  ;;  %v783_v19 = vmul.f32 %v756_v35, %v2984_v48  ;;  %v784_v53 = vmul.f32 %v756_v35, %v2986_v45  ;;  %v785_v62 = vmul.f32 %v756_v35, %v2988_v46 }
 0x1bf   :  { %v786_v49 = vmul.f32 %v756_v35, %v2990_v39  ;;  %v787_v60 = vmul.f32 %v756_v35, %v2992_v43  ;;  %v788_v51 = vmul.f32 %v756_v35, %v2994_v44  ;;  %v789_v52 = vmul.f32 %v756_v35, %v2996_v37 }
 0x1c0   :  { %v3129_v24 = vadd.f32 %v2047_v14, %v758_v25  ;;  %v3131_v23 = vadd.f32 %v2047_v14, %v759_v50  ;;  %v3133_v59 = vadd.f32 %v2047_v14, %v760_v30  ;;  %v3135_v56 = vadd.f32 %v2047_v14, %v761_v12 }
 0x1c1   :  { %v3137_v48 = vadd.f32 %v2047_v14, %v762_v40  ;;  %v3139_v45 = vadd.f32 %v2047_v14, %v763_v47  ;;  %v3141_v46 = vadd.f32 %v2047_v14, %v764_v32  ;;  %v3143_v39 = vadd.f32 %v2047_v14, %v765_v22 }
 0x1c2   :  { %v3145_v43 = vadd.f32 %v2047_v14, %v766_v55  ;;  %v3147_v44 = vadd.f32 %v2047_v14, %v767_v20  ;;  %v3149_v37 = vadd.f32 %v2047_v14, %v768_v38  ;;  %v3151_v58 = vadd.f32 %v2047_v14, %v769_v26 }
 0x1c3   :  { %v3153_v54 = vadd.f32 %v2047_v14, %v770_v27  ;;  %v3155_v36 = vadd.f32 %v2047_v14, %v771_v33  ;;  %v3157_v35 = vadd.f32 %v2047_v14, %v772_v18  ;;  %v3159_v25 = vadd.f32 %v2047_v14, %v773_v28 }
 0x1c4   :  { %v3161_v50 = vadd.f32 %v2047_v14, %v774_v34  ;;  %v3163_v30 = vadd.f32 %v2047_v14, %v775_v61  ;;  %v3165_v12 = vadd.f32 %v2047_v14, %v776_v29  ;;  %v3167_v40 = vadd.f32 %v2047_v14, %v777_v31 }
 0x1c5   :  { %v3169_v47 = vadd.f32 %v2047_v14, %v778_v21  ;;  %v3171_v32 = vadd.f32 %v2047_v14, %v779_v57  ;;  %v3173_v22 = vadd.f32 %v2047_v14, %v780_v42  ;;  %v3175_v55 = vadd.f32 %v2047_v14, %v781_v16 }
 0x1c6   :  { %v3177_v20 = vadd.f32 %v2047_v14, %v782_v17  ;;  %v3179_v38 = vadd.f32 %v2047_v14, %v783_v19  ;;  %v3181_v26 = vadd.f32 %v2047_v14, %v784_v53  ;;  %v3183_v27 = vadd.f32 %v2047_v14, %v785_v62 }
 0x1c7   :  { %v3185_v33 = vadd.f32 %v2047_v14, %v786_v49  ;;  %v3187_v18 = vadd.f32 %v2047_v14, %v787_v60  ;;  %v3189_v28 = vadd.f32 %v2047_v14, %v788_v51  ;;  %v3191_v34 = vadd.f32 %v2047_v14, %v789_v52 }
 0x1c8   :  { %v829_v61 = vmax.f32 %v3129_v24, 0.0  ;;  %v830_v29 = vmax.f32 %v3131_v23, 0.0  ;;  %v831_v31 = vmax.f32 %v3133_v59, 0.0  ;;  %v832_v21 = vmax.f32 %v3135_v56, 0.0 }
 0x1c9   :  { %v833_v57 = vmax.f32 %v3137_v48, 0.0  ;;  %v834_v42 = vmax.f32 %v3139_v45, 0.0  ;;  %v835_v16 = vmax.f32 %v3141_v46, 0.0  ;;  %v852_v60 = vmax.f32 %v3175_v55, 0.0 }
 0x1ca   :  { %v853_v51 = vmax.f32 %v3177_v20, 0.0  ;;  %v855_v41 = vmax.f32 %v3181_v26, 0.0 }
 0x1cb   :  { %2331 = dma.done.wait [#allocation4], 4096 }
 0x1cc   :  { %2332 = vsyncadd [#allocation4], 4294963200  ;;  %v2335_v49 = vmov 0.0   ;;  %v2183_v52 = vpack.c.bf16 %v2415_v3, %v2405_v1  ;;  %v930_v17 = vld [vmem:[%s4084_s6 + $0x8] sm:$0xff]  ;;  %v929_v14 = vld [vmem:[%s4084_s6] sm:$0xff]  ;;  %vm931_vm1 = vcmask 64512   ;;  %v2185_v53 = vpack.c.bf16 %v2410_v2, %v2400_v0 }
 0x1cd   :  { %1092 = vmatprep.mubr.f32.mxu1 %v2335_v49  ;;  %v897_v62 = vld [vmem:[%s4079_s1] sm:$0xff]  ;;  %1028 = vmatprep.subr.mxu1 %v930_v17  ;;  %v2187_v1 = vpack.c.bf16 %v2435_v7, %v2425_v5  ;;  %v898_v3 = vld [vmem:[%s4079_s1 + $0x8] sm:$0xff]  ;;  %v2189_v19 = vpack.c.bf16 %v2430_v6, %v2420_v4  ;;  %v2191_v0 = vpack.c.bf16 %v2455_v11, %v2445_v9  ;;  %v899_v2 = vld [vmem:[%s4079_s1 + $0x10] sm:$0xff]  ;;  %v4173_v24 = vmax.f32 %v3143_v39, 0.0 }
 0x1ce   :  { %1029 = vmatpush1.msra.mxu1 %v929_v14  ;;  %v2193_v5 = vpack.c.bf16 %v2450_v10, %v2440_v8  ;;  %v2195_v4 = vpack.c.bf16 %v2475_v15, %v2465_v13  ;;  %v900_v6 = vld [vmem:[%s4079_s1 + $0x18] sm:$0xff]  ;;  %v4155_v7 = vld [vmem:[#allocation9_spill] sm:$0xff]  ;;  %v4156_v9 = vld [vmem:[#allocation10_spill] sm:$0xff]  ;;  %v4174_v23 = vmax.f32 %v3145_v43, 0.0  ;;  %v4175_v59 = vmax.f32 %v3147_v44, 0.0 }
 0x1cf   :  { %2048 = vmatmul.mubr.msk.f32.vlgmr.msra.gmra.mrb[0].mxu1 %vm931_vm1, %v897_v62  ;;  %2184 = vmatprep.subr.bf16.mxu1 %v2183_v52  ;;  %v2197_v11 = vpack.c.bf16 %v4156_v9, %v4155_v7  ;;  %v4157_v17 = vld [vmem:[#allocation12_spill] sm:$0xff]  ;;  %v901_v10 = vld [vmem:[%s4079_s1 + $0x20] sm:$0xff]  ;;  %v4159_v13 = vld [vmem:[#allocation11_spill] sm:$0xff]  ;;  %v4176_v56 = vmax.f32 %v3149_v37, 0.0  ;;  %v4177_v48 = vmax.f32 %v3151_v58, 0.0  ;;  %v4178_v45 = vmax.f32 %v3153_v54, 0.0 }
 0x1d0   :  { %2186 = vmatpush1.bf16.msra.mxu1 %v2185_v53  ;;  %1098 = vmatprep.mubr.f32.mxu1 %v2335_v49  ;;  %v4160_v15 = vld [vmem:[#allocation13_spill] sm:$0xff]  ;;  %v4161_v53 = vld [vmem:[#allocation16_spill] sm:$0xff]  ;;  %v4162_v62 = vld [vmem:[#allocation18_spill] sm:$0xff]  ;;  %v4179_v46 = vmax.f32 %v3155_v36, 0.0  ;;  %v4180_v39 = vmax.f32 %v3157_v35, 0.0  ;;  %v4181_v43 = vmax.f32 %v3159_v25, 0.0 }
 0x1d1   :  { %2188 = vmatprep.subr.bf16.mxu1 %v2187_v1  ;;  %v2201_v14 = vpack.c.bf16 %v4160_v15, %v4159_v13  ;;  %v2203_v52 = vpack.c.bf16 %v4162_v62, %v4161_v53  ;;  %v902_v1 = vld [vmem:[%s4079_s1 + $0x28] sm:$0xff]  ;;  %v903_v7 = vld [vmem:[%s4079_s1 + $0x30] sm:$0xff]  ;;  %v904_v13 = vld [vmem:[%s4079_s1 + $0x38] sm:$0xff]  ;;  %v4182_v44 = vmax.f32 %v3161_v50, 0.0  ;;  %v4183_v37 = vmax.f32 %v3163_v30, 0.0 }
 0x1d2   :  { %v4167_v9 = vld [vmem:[#allocation19_spill] sm:$0xff]  ;;  %v905_v62 = vld [vmem:[%s4079_s1 + $0x40] sm:$0xff]  ;;  %v4184_v58 = vmax.f32 %v3165_v12, 0.0  ;;  %v4185_v54 = vmax.f32 %v3167_v40, 0.0  ;;  %v4186_v36 = vmax.f32 %v3169_v47, 0.0  ;;  %v4187_v35 = vmax.f32 %v3171_v32, 0.0 }
 0x1d3   :  { %2049 = vmatmul.mubr.msk.f32.gmra.mrb[2].mxu1 %vm931_vm1, %v898_v3  ;;  %v4163_v3 = vld [vmem:[#allocation15_spill] sm:$0xff]  ;;  %v4188_v25 = vmax.f32 %v3173_v22, 0.0  ;;  %v4189_v50 = vmax.f32 %v3179_v38, 0.0  ;;  %v4190_v30 = vmax.f32 %v3183_v27, 0.0  ;;  %v4191_v12 = vmax.f32 %v3185_v33, 0.0 }
 0x1d4   :  { %1104 = vmatprep.mubr.f32.mxu1 %v2335_v49  ;;  %2190 = vmatpush1.bf16.msra.mxu1 %v2189_v19  ;;  %v4158_v19 = vld [vmem:[#allocation14_spill] sm:$0xff]  ;;  %v4171_v15 = vld [vmem:[#allocation23_spill] sm:$0xff]  ;;  %v4192_v40 = vmax.f32 %v3187_v18, 0.0  ;;  %v4193_v47 = vmax.f32 %v3189_v28, 0.0  ;;  %v1542_v32 = vld [vmem:[%s4085_s7] sm:$0x3] }
 0x1d5   :  { %2192 = vmatprep.subr.bf16.mxu1 %v2191_v0  ;;  %v2199_v8 = vpack.c.bf16 %v4158_v19, %v4157_v17  ;;  %v4164_v0 = vld [vmem:[#allocation17_spill] sm:$0xff]  ;;  %v4169_v19 = vld [vmem:[#allocation24_spill] sm:$0xff]  ;;  %v1550_v22 = vsub.s32 1, %v3086_v63  ;;  %v4195_v55 = vsub.s32 0, %v3086_v63 }
 0x1d7   :  { %2050 = vmatmul.mubr.msk.f32.gmra.mrb[4].mxu1 %vm931_vm1, %v899_v2  ;;  %v2205_v2 = vpack.c.bf16 %v4164_v0, %v4163_v3  ;;  %v908_v3 = vld [vmem:[%s4079_s1 + $0x58] sm:$0xff]  ;;  %v909_v0 = vld [vmem:[%s4079_s1 + $0x60] sm:$0xff]  ;;  %v3525_v20 = vrot.slane %v1542_v32, %v4195_v55  ;;  %v3527_v38 = vrot.slane %v1542_v32, %v1550_v22 }
 0x1d8   :  { %1110 = vmatprep.mubr.f32.mxu1 %v2335_v49  ;;  %2194 = vmatpush1.bf16.msra.mxu1 %v2193_v5  ;;  %v4165_v5 = vld [vmem:[#allocation20_spill] sm:$0xff] }
 0x1d9   :  { %2196 = vmatprep.subr.bf16.mxu1 %v2195_v4  ;;  %v4166_v4 = vld [vmem:[#allocation22_spill] sm:$0xff] }
 0x1db   :  { %2051 = vmatmul.mubr.msk.f32.gmra.mrb[6].mxu1 %vm931_vm1, %v900_v6  ;;  %v2207_v6 = vpack.c.bf16 %v4166_v4, %v4165_v5  ;;  %v911_v5 = vld [vmem:[%s4079_s1 + $0x70] sm:$0xff]  ;;  %v912_v4 = vld [vmem:[%s4079_s1 + $0x78] sm:$0xff] }
 0x1dc   :  { %1116 = vmatprep.mubr.f32.mxu1 %v2335_v49  ;;  %2198 = vmatpush1.bf16.msra.mxu1 %v2197_v11  ;;  %v4168_v11 = vld [vmem:[#allocation21_spill] sm:$0xff] }
 0x1dd   :  { %2200 = vmatprep.subr.bf16.mxu1 %v2199_v8  ;;  %v2209_v17 = vpack.c.bf16 %v4168_v11, %v4167_v9  ;;  %v4170_v8 = vld [vmem:[#allocation26_spill] sm:$0xff]  ;;  %v915_v9 = vld [vmem:[%s4079_s1 + $0x90] sm:$0xff]  ;;  %v916_v11 = vld [vmem:[%s4079_s1 + $0x98] sm:$0xff] }
 0x1df   :  { %2052 = vmatmul.mubr.msk.f32.gmra.mrb[8].mxu1 %vm931_vm1, %v901_v10  ;;  %v2211_v10 = vpack.c.bf16 %v4170_v8, %v4169_v19  ;;  %v918_v19 = vld [vmem:[%s4079_s1 + $0xa8] sm:$0xff]  ;;  %v919_v8 = vld [vmem:[%s4079_s1 + $0xb0] sm:$0xff] }
 0x1e0   :  { %1122 = vmatprep.mubr.f32.mxu1 %v2335_v49  ;;  %2202 = vmatpush1.bf16.msra.mxu1 %v2201_v14  ;;  %v4172_v14 = vld [vmem:[#allocation25_spill] sm:$0xff] }
 0x1e1   :  { %2204 = vmatprep.subr.bf16.mxu1 %v2203_v52  ;;  %v2213_v53 = vpack.c.bf16 %v4172_v14, %v4171_v15  ;;  %v906_v52 = vld [vmem:[%s4079_s1 + $0x48] sm:$0xff]  ;;  %v923_v14 = vld [vmem:[%s4079_s1 + $0xd0] sm:$0xff] }
 0x1e2   :  { %v922_v15 = vld [vmem:[%s4079_s1 + $0xc8] sm:$0xff] }
 0x1e3   :  { %2053 = vmatmul.mubr.msk.f32.gmra.mrb[10].mxu1 %vm931_vm1, %v902_v1  ;;  %v907_v1 = vld [vmem:[%s4079_s1 + $0x50] sm:$0xff] }
 0x1e4   :  { %1128 = vmatprep.mubr.f32.mxu1 %v2335_v49  ;;  %2206 = vmatpush1.bf16.msra.mxu1 %v2205_v2  ;;  %v910_v2 = vld [vmem:[%s4079_s1 + $0x68] sm:$0xff] }
 0x1e5   :  { %2208 = vmatprep.subr.bf16.mxu1 %v2207_v6  ;;  %v913_v6 = vld [vmem:[%s4079_s1 + $0x80] sm:$0xff] }
 0x1e7   :  { %2054 = vmatmul.mubr.msk.f32.gmra.mrb[12].mxu1 %vm931_vm1, %v903_v7  ;;  %v914_v7 = vld [vmem:[%s4079_s1 + $0x88] sm:$0xff] }
 0x1e8   :  { %1134 = vmatprep.mubr.f32.mxu1 %v2335_v49  ;;  %2210 = vmatpush1.bf16.msra.mxu1 %v2209_v17  ;;  %v917_v17 = vld [vmem:[%s4079_s1 + $0xa0] sm:$0xff] }
 0x1e9   :  { %2212 = vmatprep.subr.bf16.mxu1 %v2211_v10  ;;  %v920_v10 = vld [vmem:[%s4079_s1 + $0xb8] sm:$0xff] }
 0x1eb   :  { %2055 = vmatmul.mubr.msk.f32.gmra.mrb[14].mxu1 %vm931_vm1, %v904_v13  ;;  %v921_v13 = vld [vmem:[%s4079_s1 + $0xc0] sm:$0xff] }
 0x1ec   :  { %1140 = vmatprep.mubr.f32.mxu1 %v2335_v49  ;;  %2214 = vmatpush1.bf16.msra.mxu1 %v2213_v53  ;;  %v924_v53 = vld [vmem:[%s4079_s1 + $0xd8] sm:$0xff] }
 0x1ef   :  { %2056 = vmatmul.mubr.msk.f32.gmra.mrb[16].mxu1 %vm931_vm1, %v905_v62  ;;  %v925_v62 = vld [vmem:[%s4079_s1 + $0xe0] sm:$0xff] }
 0x1f0   :  { %1146 = vmatprep.mubr.f32.mxu1 %v2335_v49 }
 0x1f3   :  { %2057 = vmatmul.mubr.msk.f32.gmra.mrb[18].mxu1 %vm931_vm1, %v906_v52  ;;  %v926_v52 = vld [vmem:[%s4079_s1 + $0xe8] sm:$0xff] }
 0x1f4   :  { %1152 = vmatprep.mubr.f32.mxu1 %v2335_v49 }
 0x1f7   :  { %2058 = vmatmul.mubr.msk.f32.gmra.mrb[20].mxu1 %vm931_vm1, %v907_v1  ;;  %v927_v1 = vld [vmem:[%s4079_s1 + $0xf0] sm:$0xff] }
 0x1f8   :  { %1158 = vmatprep.mubr.f32.mxu1 %v2335_v49 }
 0x1fb   :  { %2059 = vmatmul.mubr.msk.f32.gmra.mrb[22].mxu1 %vm931_vm1, %v908_v3  ;;  %v928_v3 = vld [vmem:[%s4079_s1 + $0xf8] sm:$0xff] }
 0x1fc   :  { %1164 = vmatprep.mubr.f32.mxu1 %v2335_v49 }
 0x1ff   :  { %2060 = vmatmul.mubr.msk.f32.gmra.mrb[24].mxu1 %vm931_vm1, %v909_v0 }
 0x200   :  { %1170 = vmatprep.mubr.f32.mxu1 %v2335_v49 }
 0x203   :  { %2061 = vmatmul.mubr.msk.f32.gmra.mrb[26].mxu1 %vm931_vm1, %v910_v2 }
 0x204   :  { %1176 = vmatprep.mubr.f32.mxu1 %v2335_v49 }
 0x207   :  { %2062 = vmatmul.mubr.msk.f32.gmra.mrb[28].mxu1 %vm931_vm1, %v911_v5 }
 0x208   :  { %1182 = vmatprep.mubr.f32.mxu1 %v2335_v49 }
 0x20b   :  { %2063 = vmatmul.mubr.msk.f32.gmra.mrb[30].mxu1 %vm931_vm1, %v912_v4 }
 0x20c   :  { %1188 = vmatprep.mubr.f32.mxu1 %v2335_v49 }
 0x20f   :  { %2064 = vmatmul.mubr.msk.f32.gmra.mrb[32].mxu1 %vm931_vm1, %v913_v6 }
 0x210   :  { %1194 = vmatprep.mubr.f32.mxu1 %v2335_v49 }
 0x213   :  { %2065 = vmatmul.mubr.msk.f32.gmra.mrb[34].mxu1 %vm931_vm1, %v914_v7 }
 0x214   :  { %1200 = vmatprep.mubr.f32.mxu1 %v2335_v49 }
 0x217   :  { %2066 = vmatmul.mubr.msk.f32.gmra.mrb[36].mxu1 %vm931_vm1, %v915_v9 }
 0x218   :  { %1206 = vmatprep.mubr.f32.mxu1 %v2335_v49 }
 0x21b   :  { %2067 = vmatmul.mubr.msk.f32.gmra.mrb[38].mxu1 %vm931_vm1, %v916_v11 }
 0x21c   :  { %1212 = vmatprep.mubr.f32.mxu1 %v2335_v49 }
 0x21f   :  { %2068 = vmatmul.mubr.msk.f32.gmra.mrb[40].mxu1 %vm931_vm1, %v917_v17 }
 0x220   :  { %1218 = vmatprep.mubr.f32.mxu1 %v2335_v49 }
 0x223   :  { %2069 = vmatmul.mubr.msk.f32.gmra.mrb[42].mxu1 %vm931_vm1, %v918_v19 }
 0x224   :  { %1224 = vmatprep.mubr.f32.mxu1 %v2335_v49 }
 0x227   :  { %2070 = vmatmul.mubr.msk.f32.gmra.mrb[44].mxu1 %vm931_vm1, %v919_v8 }
 0x228   :  { %1230 = vmatprep.mubr.f32.mxu1 %v2335_v49 }
 0x22b   :  { %2071 = vmatmul.mubr.msk.f32.gmra.mrb[46].mxu1 %vm931_vm1, %v920_v10 }
 0x22c   :  { %1236 = vmatprep.mubr.f32.mxu1 %v2335_v49 }
 0x22f   :  { %2072 = vmatmul.mubr.msk.f32.gmra.mrb[48].mxu1 %vm931_vm1, %v921_v13 }
 0x230   :  { %1242 = vmatprep.mubr.f32.mxu1 %v2335_v49 }
 0x233   :  { %2073 = vmatmul.mubr.msk.f32.gmra.mrb[50].mxu1 %vm931_vm1, %v922_v15 }
 0x234   :  { %1248 = vmatprep.mubr.f32.mxu1 %v2335_v49 }
 0x237   :  { %2074 = vmatmul.mubr.msk.f32.gmra.mrb[52].mxu1 %vm931_vm1, %v923_v14 }
 0x238   :  { %1254 = vmatprep.mubr.f32.mxu1 %v2335_v49 }
 0x23b   :  { %2075 = vmatmul.mubr.msk.f32.gmra.mrb[54].mxu1 %vm931_vm1, %v924_v53 }
 0x23c   :  { %1260 = vmatprep.mubr.f32.mxu1 %v2335_v49 }
 0x23f   :  { %2076 = vmatmul.mubr.msk.f32.gmra.mrb[56].mxu1 %vm931_vm1, %v925_v62 }
 0x240   :  { %1266 = vmatprep.mubr.f32.mxu1 %v2335_v49 }
 0x243   :  { %2077 = vmatmul.mubr.msk.f32.gmra.mrb[58].mxu1 %vm931_vm1, %v926_v52 }
 0x244   :  { %1272 = vmatprep.mubr.f32.mxu1 %v2335_v49 }
 0x247   :  { %2078 = vmatmul.mubr.msk.f32.gmra.mrb[60].mxu1 %vm931_vm1, %v927_v1 }
 0x248   :  { %1278 = vmatprep.mubr.f32.mxu1 %v2335_v49 }
 0x24b   :  { %2079 = vmatmul.mubr.msk.f32.gmra.mrb[62].mxu1 %vm931_vm1, %v928_v3 }
 0x24c   :  { %1349 = vmatprep.mubr.f32.mxu1 %v2335_v49 }
 0x24f   :  { %1350 = vmatmul.mubr.f32.vlgmr.msra.gmra.mrb[0].mxu1 %v829_v61 }
 0x250   :  { %1355 = vmatprep.mubr.f32.mxu1 %v2335_v49 }
 0x253   :  { %1356 = vmatmul.mubr.f32.gmra.mrb[2].mxu1 %v830_v29 }
 0x254   :  { %1361 = vmatprep.mubr.f32.mxu1 %v2335_v49 }
 0x257   :  { %1362 = vmatmul.mubr.f32.gmra.mrb[4].mxu1 %v831_v31 }
 0x258   :  { %1367 = vmatprep.mubr.f32.mxu1 %v2335_v49 }
 0x25b   :  { %1368 = vmatmul.mubr.f32.gmra.mrb[6].mxu1 %v832_v21 }
 0x25c   :  { %1373 = vmatprep.mubr.f32.mxu1 %v2335_v49 }
 0x25f   :  { %1374 = vmatmul.mubr.f32.gmra.mrb[8].mxu1 %v833_v57 }
 0x260   :  { %1379 = vmatprep.mubr.f32.mxu1 %v2335_v49 }
 0x263   :  { %1380 = vmatmul.mubr.f32.gmra.mrb[10].mxu1 %v834_v42 }
 0x264   :  { %1385 = vmatprep.mubr.f32.mxu1 %v2335_v49 }
 0x267   :  { %1386 = vmatmul.mubr.f32.gmra.mrb[12].mxu1 %v835_v16 }
 0x268   :  { %1391 = vmatprep.mubr.f32.mxu1 %v2335_v49 }
 0x26b   :  { %1392 = vmatmul.mubr.f32.gmra.mrb[14].mxu1 %v4173_v24 }
 0x26c   :  { %1397 = vmatprep.mubr.f32.mxu1 %v2335_v49 }
 0x26f   :  { %1398 = vmatmul.mubr.f32.gmra.mrb[16].mxu1 %v4174_v23 }
 0x270   :  { %1403 = vmatprep.mubr.f32.mxu1 %v2335_v49 }
 0x273   :  { %1404 = vmatmul.mubr.f32.gmra.mrb[18].mxu1 %v4175_v59 }
 0x274   :  { %1409 = vmatprep.mubr.f32.mxu1 %v2335_v49 }
 0x277   :  { %1410 = vmatmul.mubr.f32.gmra.mrb[20].mxu1 %v4176_v56 }
 0x278   :  { %1415 = vmatprep.mubr.f32.mxu1 %v2335_v49 }
 0x27b   :  { %1416 = vmatmul.mubr.f32.gmra.mrb[22].mxu1 %v4177_v48 }
 0x27c   :  { %1421 = vmatprep.mubr.f32.mxu1 %v2335_v49 }
 0x27f   :  { %1422 = vmatmul.mubr.f32.gmra.mrb[24].mxu1 %v4178_v45 }
 0x280   :  { %1427 = vmatprep.mubr.f32.mxu1 %v2335_v49 }
 0x283   :  { %1428 = vmatmul.mubr.f32.gmra.mrb[26].mxu1 %v4179_v46 }
 0x284   :  { %1433 = vmatprep.mubr.f32.mxu1 %v2335_v49 }
 0x287   :  { %1434 = vmatmul.mubr.f32.gmra.mrb[28].mxu1 %v4180_v39 }
 0x288   :  { %1439 = vmatprep.mubr.f32.mxu1 %v2335_v49 }
 0x28b   :  { %1440 = vmatmul.mubr.f32.gmra.mrb[30].mxu1 %v4181_v43 }
 0x28c   :  { %1445 = vmatprep.mubr.f32.mxu1 %v2335_v49 }
 0x28f   :  { %1446 = vmatmul.mubr.f32.gmra.mrb[32].mxu1 %v4182_v44 }
 0x290   :  { %1451 = vmatprep.mubr.f32.mxu1 %v2335_v49 }
 0x293   :  { %1452 = vmatmul.mubr.f32.gmra.mrb[34].mxu1 %v4183_v37 }
 0x294   :  { %1457 = vmatprep.mubr.f32.mxu1 %v2335_v49 }
 0x297   :  { %1458 = vmatmul.mubr.f32.gmra.mrb[36].mxu1 %v4184_v58 }
 0x298   :  { %1463 = vmatprep.mubr.f32.mxu1 %v2335_v49 }
 0x29b   :  { %1464 = vmatmul.mubr.f32.gmra.mrb[38].mxu1 %v4185_v54 }
 0x29c   :  { %1469 = vmatprep.mubr.f32.mxu1 %v2335_v49 }
 0x29f   :  { %1470 = vmatmul.mubr.f32.gmra.mrb[40].mxu1 %v4186_v36 }
 0x2a0   :  { %1475 = vmatprep.mubr.f32.mxu1 %v2335_v49 }
 0x2a3   :  { %1476 = vmatmul.mubr.f32.gmra.mrb[42].mxu1 %v4187_v35 }
 0x2a4   :  { %1481 = vmatprep.mubr.f32.mxu1 %v2335_v49 }
 0x2a7   :  { %1482 = vmatmul.mubr.f32.gmra.mrb[44].mxu1 %v4188_v25 }
 0x2a8   :  { %1487 = vmatprep.mubr.f32.mxu1 %v2335_v49 }
 0x2ab   :  { %1488 = vmatmul.mubr.f32.gmra.mrb[46].mxu1 %v852_v60 }
 0x2ac   :  { %1493 = vmatprep.mubr.f32.mxu1 %v2335_v49 }
 0x2af   :  { %1494 = vmatmul.mubr.f32.gmra.mrb[48].mxu1 %v853_v51 }
 0x2b0   :  { %1499 = vmatprep.mubr.f32.mxu1 %v2335_v49 }
 0x2b3   :  { %1500 = vmatmul.mubr.f32.gmra.mrb[50].mxu1 %v4189_v50 }
 0x2b4   :  { %1505 = vmatprep.mubr.f32.mxu1 %v2335_v49 }
 0x2b7   :  { %1506 = vmatmul.mubr.f32.gmra.mrb[52].mxu1 %v855_v41  ;;  %v4194_v41 = vmax.f32 %v3191_v34, 0.0 }
 0x2b8   :  { %1511 = vmatprep.mubr.f32.mxu1 %v2335_v49 }
 0x2bb   :  { %1512 = vmatmul.mubr.f32.gmra.mrb[54].mxu1 %v4190_v30 }
 0x2bc   :  { %1517 = vmatprep.mubr.f32.mxu1 %v2335_v49 }
 0x2bf   :  { %1518 = vmatmul.mubr.f32.gmra.mrb[56].mxu1 %v4191_v12 }
 0x2c0   :  { %1523 = vmatprep.mubr.f32.mxu1 %v2335_v49 }
 0x2c3   :  { %1524 = vmatmul.mubr.f32.gmra.mrb[58].mxu1 %v4192_v40 }
 0x2c4   :  { %1529 = vmatprep.mubr.f32.mxu1 %v2335_v49 }
 0x2c7   :  { %1530 = vmatmul.mubr.f32.gmra.mrb[60].mxu1 %v4193_v47 }
 0x2c8   :  { %1535 = vmatprep.mubr.f32.mxu1 %v2335_v49 }
 0x2cb   :  { %1536 = vmatmul.mubr.f32.gmra.mrb[62].mxu1 %v4194_v41 }
 0x322   :  { %v1351_v26 = vpop.f32.mrb[0].mxu1 }
 0x323   :  { %v3530_v27 = vadd.f32 %v3525_v20, %v1351_v26  ;;  %v1353_v33 = vpop.f32.mrb[1].mxu1 }
 0x324   :  { %v3533_v18 = vadd.f32 %v3527_v38, %v1353_v33 }
 0x326   :  { %v1357_v61 = vpop.f32.mrb[2].mxu1 }
 0x327   :  { %v3538_v29 = vadd.f32 %v3525_v20, %v1357_v61  ;;  %v1359_v63 = vpop.f32.mrb[3].mxu1 }
 0x328   :  { %v3541_v31 = vadd.f32 %v3527_v38, %v1359_v63 }
 0x32a   :  { %v1363_v42 = vpop.f32.mrb[4].mxu1 }
 0x32b   :  { %v3546_v16 = vadd.f32 %v3525_v20, %v1363_v42  ;;  %v1365_v49 = vpop.f32.mrb[5].mxu1 }
 0x32c   :  { %v3549_v60 = vadd.f32 %v3527_v38, %v1365_v49 }
 0x32e   :  { %v1369_v2 = vpop.f32.mrb[6].mxu1 }
 0x32f   :  { %v3554_v5 = vadd.f32 %v3525_v20, %v1369_v2  ;;  %v1371_v4 = vpop.f32.mrb[7].mxu1 }
 0x330   :  { %v3557_v6 = vadd.f32 %v3527_v38, %v1371_v4 }
 0x332   :  { %v1375_v11 = vpop.f32.mrb[8].mxu1 }
 0x333   :  { %v3562_v17 = vadd.f32 %v3525_v20, %v1375_v11  ;;  %v1377_v19 = vpop.f32.mrb[9].mxu1 }
 0x334   :  { %v3565_v8 = vadd.f32 %v3527_v38, %v1377_v19 }
 0x336   :  { %v1381_v15 = vpop.f32.mrb[10].mxu1 }
 0x337   :  { %v3570_v14 = vadd.f32 %v3525_v20, %v1381_v15  ;;  %v1383_v53 = vpop.f32.mrb[11].mxu1 }
 0x338   :  { %v3573_v62 = vadd.f32 %v3527_v38, %v1383_v53 }
 0x33a   :  { %v1387_v3 = vpop.f32.mrb[12].mxu1 }
 0x33b   :  { %v3578_v24 = vadd.f32 %v3525_v20, %v1387_v3  ;;  %v1389_v23 = vpop.f32.mrb[13].mxu1 }
 0x33c   :  { %v3581_v59 = vadd.f32 %v3527_v38, %v1389_v23 }
 0x33e   :  { %v1393_v45 = vpop.f32.mrb[14].mxu1 }
 0x33f   :  { %v3586_v46 = vadd.f32 %v3525_v20, %v1393_v45  ;;  %v1395_v39 = vpop.f32.mrb[15].mxu1 }
 0x340   :  { %v3589_v43 = vadd.f32 %v3527_v38, %v1395_v39 }
 0x342   :  { %v1399_v58 = vpop.f32.mrb[16].mxu1 }
 0x343   :  { %v3594_v54 = vadd.f32 %v3525_v20, %v1399_v58  ;;  %v1401_v36 = vpop.f32.mrb[17].mxu1 }
 0x344   :  { %v3597_v35 = vadd.f32 %v3527_v38, %v1401_v36 }
 0x346   :  { %v1405_v30 = vpop.f32.mrb[18].mxu1 }
 0x347   :  { %v3602_v12 = vadd.f32 %v3525_v20, %v1405_v30  ;;  %v1407_v40 = vpop.f32.mrb[19].mxu1 }
 0x348   :  { %v3605_v47 = vadd.f32 %v3527_v38, %v1407_v40 }
 0x34a   :  { %v1411_v22 = vpop.f32.mrb[20].mxu1 }
 0x34b   :  { %v3610_v55 = vadd.f32 %v3525_v20, %v1411_v22  ;;  %v1413_v26 = vpop.f32.mrb[21].mxu1 }
 0x34c   :  { %v3613_v33 = vadd.f32 %v3527_v38, %v1413_v26 }
 0x34e   :  { %v1417_v42 = vpop.f32.mrb[22].mxu1 }
 0x34f   :  { %v3618_v49 = vadd.f32 %v3525_v20, %v1417_v42  ;;  %v1419_v2 = vpop.f32.mrb[23].mxu1 }
 0x350   :  { %v3621_v4 = vadd.f32 %v3527_v38, %v1419_v2 }
 0x352   :  { %v1423_v15 = vpop.f32.mrb[24].mxu1 }
 0x353   :  { %v3626_v53 = vadd.f32 %v3525_v20, %v1423_v15  ;;  %v1425_v3 = vpop.f32.mrb[25].mxu1 }
 0x354   :  { %v3629_v23 = vadd.f32 %v3527_v38, %v1425_v3 }
 0x356   :  { %v1429_v58 = vpop.f32.mrb[26].mxu1 }
 0x357   :  { %v3634_v36 = vadd.f32 %v3525_v20, %v1429_v58  ;;  %v1431_v30 = vpop.f32.mrb[27].mxu1 }
 0x358   :  { %v3637_v40 = vadd.f32 %v3527_v38, %v1431_v30 }
 0x35a   :  { %v1435_v42 = vpop.f32.mrb[28].mxu1 }
 0x35b   :  { %v3642_v2 = vadd.f32 %v3525_v20, %v1435_v42  ;;  %v1437_v15 = vpop.f32.mrb[29].mxu1 }
 0x35c   :  { %v3645_v3 = vadd.f32 %v3527_v38, %v1437_v15 }
 0x35e   :  { %v1441_v39 = vpop.f32.mrb[30].mxu1 }
 0x35f   :  { %v3650_v30 = vadd.f32 %v3525_v20, %v1441_v39  ;;  %v1443_v11 = vpop.f32.mrb[31].mxu1 }
 0x360   :  { %v3653_v22 = vadd.f32 %v3527_v38, %v1443_v11 }
 0x362   :  { %v1447_v19 = vpop.f32.mrb[32].mxu1 }
 0x363   :  { %v3658_v15 = vadd.f32 %v3525_v20, %v1447_v19  ;;  %v1449_v61 = vpop.f32.mrb[33].mxu1 }
 0x364   :  { %v3661_v45 = vadd.f32 %v3527_v38, %v1449_v61 }
 0x366   :  { %v1453_v63 = vpop.f32.mrb[34].mxu1 }
 0x367   :  { %v3666_v11 = vadd.f32 %v3525_v20, %v1453_v63  ;;  %v1455_v41 = vpop.f32.mrb[35].mxu1 }
 0x368   :  { %v3669_v26 = vadd.f32 %v3527_v38, %v1455_v41 }
 0x36a   :  { %v1459_v32 = vpop.f32.mrb[36].mxu1 }
 0x36b   :  { %v3674_v61 = vadd.f32 %v3525_v20, %v1459_v32  ;;  %v1461_v25 = vpop.f32.mrb[37].mxu1 }
 0x36c   :  { %v3677_v58 = vadd.f32 %v3527_v38, %v1461_v25 }
 0x36e   :  { %v1465_v50 = vpop.f32.mrb[38].mxu1 }
 0x36f   :  { %v3682_v41 = vadd.f32 %v3525_v20, %v1465_v50  ;;  %v1467_v44 = vpop.f32.mrb[39].mxu1 }
 0x370   :  { %v3685_v42 = vadd.f32 %v3527_v38, %v1467_v44 }
 0x372   :  { %v1471_v37 = vpop.f32.mrb[40].mxu1 }
 0x373   :  { %v3690_v25 = vadd.f32 %v3525_v20, %v1471_v37  ;;  %v1473_v56 = vpop.f32.mrb[41].mxu1 }
 0x374   :  { %v3693_v39 = vadd.f32 %v3527_v38, %v1473_v56 }
 0x376   :  { %v1477_v48 = vpop.f32.mrb[42].mxu1 }
 0x377   :  { %v3698_v44 = vadd.f32 %v3525_v20, %v1477_v48  ;;  %v1479_v52 = vpop.f32.mrb[43].mxu1 }
 0x378   :  { %v3701_v19 = vadd.f32 %v3527_v38, %v1479_v52 }
 0x37a   :  { %v1483_v1 = vpop.f32.mrb[44].mxu1 }
 0x37b   :  { %v3706_v56 = vadd.f32 %v3525_v20, %v1483_v1  ;;  %v1485_v10 = vpop.f32.mrb[45].mxu1 }
 0x37c   :  { %v3709_v63 = vadd.f32 %v3527_v38, %v1485_v10 }
 0x37e   :  { %v1489_v13 = vpop.f32.mrb[46].mxu1 }
 0x37f   :  { %v3714_v52 = vadd.f32 %v3525_v20, %v1489_v13  ;;  %v1491_v7 = vpop.f32.mrb[47].mxu1 }
 0x380   :  { %v3717_v32 = vadd.f32 %v3527_v38, %v1491_v7 }
 0x382   :  { %v1495_v9 = vpop.f32.mrb[48].mxu1 }
 0x383   :  { %v3722_v10 = vadd.f32 %v3525_v20, %v1495_v9  ;;  %v1497_v51 = vpop.f32.mrb[49].mxu1 }
 0x384   :  { %v3725_v50 = vadd.f32 %v3527_v38, %v1497_v51 }
 0x385   :  { %4196 = vst [vmem:[#allocation9_spill] sm:$0xff] %v3722_v10 }
 0x386   :  { %4197 = vst [vmem:[#allocation10_spill] sm:$0xff] %v3725_v50  ;;  %v1501_v0 = vpop.f32.mrb[50].mxu1  ;;  %v4212_v50 = vmax.f32 %v3533_v18, 0.0 }
 0x387   :  { %v3730_v7 = vadd.f32 %v3525_v20, %v1501_v0  ;;  %v1503_v21 = vpop.f32.mrb[51].mxu1 }
 0x388   :  { %v3733_v37 = vadd.f32 %v3527_v38, %v1503_v21  ;;  %1788 = vmatprep.mubr.f32.mxu0 %v4212_v50 }
 0x389   :  { %4198 = vst [vmem:[#allocation12_spill] sm:$0xff] %v3730_v7 }
 0x38a   :  { %4199 = vst [vmem:[#allocation14_spill] sm:$0xff] %v3733_v37  ;;  %v1507_v57 = vpop.f32.mrb[52].mxu1 }
 0x38b   :  { %v3738_v51 = vadd.f32 %v3525_v20, %v1507_v57  ;;  %v1509_v28 = vpop.f32.mrb[53].mxu1 }
 0x38c   :  { %v3741_v48 = vadd.f32 %v3527_v38, %v1509_v28 }
 0x38d   :  { %4200 = vst [vmem:[#allocation11_spill] sm:$0xff] %v3738_v51 }
 0x38e   :  { %4201 = vst [vmem:[#allocation13_spill] sm:$0xff] %v3741_v48  ;;  %v1513_v34 = vpop.f32.mrb[54].mxu1 }
 0x38f   :  { %v3746_v21 = vadd.f32 %v3525_v20, %v1513_v34  ;;  %v1515_v10 = vpop.f32.mrb[55].mxu1 }
 0x390   :  { %v3749_v1 = vadd.f32 %v3527_v38, %v1515_v10 }
 0x391   :  { %4202 = vst [vmem:[#allocation16_spill] sm:$0xff] %v3746_v21 }
 0x392   :  { %4203 = vst [vmem:[#allocation18_spill] sm:$0xff] %v3749_v1  ;;  %v1519_v7 = vpop.f32.mrb[56].mxu1 }
 0x393   :  { %v3754_v28 = vadd.f32 %v3525_v20, %v1519_v7  ;;  %v1521_v37 = vpop.f32.mrb[57].mxu1 }
 0x394   :  { %v3757_v13 = vadd.f32 %v3527_v38, %v1521_v37 }
 0x395   :  { %4204 = vst [vmem:[#allocation15_spill] sm:$0xff] %v3754_v28 }
 0x396   :  { %4205 = vst [vmem:[#allocation17_spill] sm:$0xff] %v3757_v13  ;;  %v1525_v51 = vpop.f32.mrb[58].mxu1 }
 0x397   :  { %v3762_v10 = vadd.f32 %v3525_v20, %v1525_v51  ;;  %v1527_v48 = vpop.f32.mrb[59].mxu1 }
 0x398   :  { %v3765_v9 = vadd.f32 %v3527_v38, %v1527_v48 }
 0x399   :  { %4206 = vst [vmem:[#allocation20_spill] sm:$0xff] %v3762_v10  ;;  %v4210_v10 = vld [vmem:[#allocation27_spill] sm:$0xff] }
 0x39a   :  { %4207 = vst [vmem:[#allocation22_spill] sm:$0xff] %v3765_v9  ;;  %v1531_v21 = vpop.f32.mrb[60].mxu1  ;;  %v4211_v9 = vld [vmem:[#allocation28_spill] sm:$0xff] }
 0x39b   :  { %v3770_v37 = vadd.f32 %v3525_v20, %v1531_v21  ;;  %v1533_v1 = vpop.f32.mrb[61].mxu1 }
 0x39c   :  { %v3773_v0 = vadd.f32 %v3527_v38, %v1533_v1  ;;  %v2216_v1 = vpack.c.bf16 %v4211_v9, %v4210_v10 }
 0x39e   :  { %v1537_v28 = vpop.f32.mrb[62].mxu1 }
 0x39f   :  { %v3778_v48 = vadd.f32 %v3525_v20, %v1537_v28  ;;  %v1539_v13 = vpop.f32.mrb[63].mxu1 }
 0x3a0   :  { %v3781_v57 = vadd.f32 %v3527_v38, %v1539_v13 }
 0x3a1   :  { %4208 = vst [vmem:[#allocation19_spill] sm:$0xff] %v3778_v48 }
 0x3a2   :  { %4209 = vst [vmem:[#allocation21_spill] sm:$0xff] %v3781_v57 }
 0x3a3   :  { %2333 = dma.done.wait [#allocation4 + $0x1], 4096 }
 0x3a4   :  { %2334 = vsyncadd [#allocation4 + $0x1], 4294963200  ;;  %v2336_v34 = vmov 0.0|0.0   ;;  %v4213_v20 = vld [vmem:[#allocation29_spill] sm:$0xff]  ;;  %v4214_v28 = vld [vmem:[#allocation30_spill] sm:$0xff] }
 0x3a5   :  { %2215 = vmatprep.subr.bf16.mxu0 %v2336_v34  ;;  %v2219_v51 = vpack.c.bf16 %v4214_v28, %v4213_v20  ;;  %v4215_v38 = vld [vmem:[#allocation31_spill] sm:$0xff]  ;;  %v4216_v13 = vld [vmem:[#allocation32_spill] sm:$0xff]  ;;  %v4217_v21 = vld [vmem:[#allocation33_spill] sm:$0xff] }
 0x3a6   :  { %2217 = vmatpush1.bf16.msra.mxu0 %v2216_v1  ;;  %v2222_v7 = vpack.c.bf16 %v4216_v13, %v4215_v38  ;;  %v4218_v9 = vld [vmem:[#allocation34_spill] sm:$0xff]  ;;  %v4219_v18 = vld [vmem:[#allocation35_spill] sm:$0xff]  ;;  %v4220_v50 = vld [vmem:[#allocation36_spill] sm:$0xff] }
 0x3a7   :  { %2218 = vmatprep.subr.bf16.mxu0 %v2336_v34  ;;  %v2225_v10 = vpack.c.bf16 %v4218_v9, %v4217_v21  ;;  %v2228_v48 = vpack.c.bf16 %v4220_v50, %v4219_v18  ;;  %v4221_v1 = vld [vmem:[#allocation37_spill] sm:$0xff]  ;;  %v4222_v57 = vld [vmem:[#allocation38_spill] sm:$0xff]  ;;  %v4224_v28 = vld [vmem:[#allocation40_spill] sm:$0xff] }
 0x3a8   :  { %v2231_v20 = vpack.c.bf16 %v4222_v57, %v4221_v1  ;;  %v4226_v13 = vld [vmem:[#allocation42_spill] sm:$0xff]  ;;  %v4227_v9 = vld [vmem:[#allocation43_spill] sm:$0xff] }
 0x3a9   :  { %v4230_v50 = vld [vmem:[#allocation46_spill] sm:$0xff]  ;;  %v4231_v1 = vld [vmem:[#allocation47_spill] sm:$0xff] }
 0x3aa   :  { %2220 = vmatpush1.bf16.msra.mxu0 %v2219_v51  ;;  %v4223_v51 = vld [vmem:[#allocation39_spill] sm:$0xff] }
 0x3ab   :  { %2221 = vmatprep.subr.bf16.mxu0 %v2336_v34  ;;  %v2234_v38 = vpack.c.bf16 %v4224_v28, %v4223_v51  ;;  %v4233_v28 = vld [vmem:[#allocation49_spill] sm:$0xff] }
 0x3ae   :  { %2223 = vmatpush1.bf16.msra.mxu0 %v2222_v7  ;;  %v4225_v7 = vld [vmem:[#allocation41_spill] sm:$0xff] }
 0x3af   :  { %2224 = vmatprep.subr.bf16.mxu0 %v2336_v34  ;;  %v2237_v21 = vpack.c.bf16 %v4226_v13, %v4225_v7  ;;  %v4235_v13 = vld [vmem:[#allocation51_spill] sm:$0xff] }
 0x3b2   :  { %2226 = vmatpush1.bf16.msra.mxu0 %v2225_v10  ;;  %v4228_v10 = vld [vmem:[#allocation44_spill] sm:$0xff] }
 0x3b3   :  { %2227 = vmatprep.subr.bf16.mxu0 %v2336_v34  ;;  %v2240_v18 = vpack.c.bf16 %v4228_v10, %v4227_v9  ;;  %v4237_v10 = vld [vmem:[#allocation53_spill] sm:$0xff] }
 0x3b6   :  { %2229 = vmatpush1.bf16.msra.mxu0 %v2228_v48  ;;  %v4229_v48 = vld [vmem:[#allocation45_spill] sm:$0xff] }
 0x3b7   :  { %2230 = vmatprep.subr.bf16.mxu0 %v2336_v34  ;;  %v2243_v57 = vpack.c.bf16 %v4230_v50, %v4229_v48  ;;  %v4239_v50 = vld [vmem:[#allocation55_spill] sm:$0xff] }
 0x3ba   :  { %2232 = vmatpush1.bf16.msra.mxu0 %v2231_v20  ;;  %v4232_v20 = vld [vmem:[#allocation48_spill] sm:$0xff] }
 0x3bb   :  { %2233 = vmatprep.subr.bf16.mxu0 %v2336_v34  ;;  %v2246_v51 = vpack.c.bf16 %v4232_v20, %v4231_v1  ;;  %v4241_v20 = vld [vmem:[#allocation57_spill] sm:$0xff] }
 0x3be   :  { %2235 = vmatpush1.bf16.msra.mxu0 %v2234_v38  ;;  %v4234_v38 = vld [vmem:[#allocation50_spill] sm:$0xff] }
 0x3bf   :  { %2236 = vmatprep.subr.bf16.mxu0 %v2336_v34  ;;  %v2249_v7 = vpack.c.bf16 %v4234_v38, %v4233_v28  ;;  %v4243_v38 = vmax.f32 %v3530_v27, 0.0  ;;  %v4250_v27 = vmax.f32 %v3565_v8, 0.0  ;;  %v4257_v8 = vmax.f32 %v3586_v46, 0.0 }
 0x3c0   :  { %v4264_v46 = vmax.f32 %v3621_v4, 0.0  ;;  %v4271_v4 = vmax.f32 %v3642_v2, 0.0  ;;  %v4278_v2 = vmax.f32 %v3677_v58, 0.0  ;;  %v4285_v58 = vmax.f32 %v3698_v44, 0.0  ;;  %v4294_v44 = vld [vmem:[#allocation14_spill] sm:$0xff] }
 0x3c2   :  { %2238 = vmatpush1.bf16.msra.mxu0 %v2237_v21  ;;  %v4236_v21 = vld [vmem:[#allocation52_spill] sm:$0xff] }
 0x3c3   :  { %2239 = vmatprep.subr.bf16.mxu0 %v2336_v34  ;;  %v2252_v9 = vpack.c.bf16 %v4236_v21, %v4235_v13  ;;  %v4245_v13 = vmax.f32 %v3538_v29, 0.0  ;;  %v4246_v21 = vmax.f32 %v3549_v60, 0.0  ;;  %v4252_v29 = vmax.f32 %v3573_v62, 0.0 }
 0x3c4   :  { %v4253_v60 = vmax.f32 %v3570_v14, 0.0  ;;  %v4259_v62 = vmax.f32 %v3594_v54, 0.0  ;;  %v4260_v14 = vmax.f32 %v3605_v47, 0.0  ;;  %v4266_v54 = vmax.f32 %v3629_v23, 0.0 }
 0x3c5   :  { %v4267_v47 = vmax.f32 %v3626_v53, 0.0  ;;  %v4273_v23 = vmax.f32 %v3650_v30, 0.0  ;;  %v4274_v53 = vmax.f32 %v3661_v45, 0.0  ;;  %v4280_v30 = vmax.f32 %v3685_v42, 0.0 }
 0x3c6   :  { %2241 = vmatpush1.bf16.msra.mxu0 %v2240_v18  ;;  %v4238_v18 = vld [vmem:[#allocation54_spill] sm:$0xff]  ;;  %v4281_v45 = vmax.f32 %v3682_v41, 0.0  ;;  %v4287_v42 = vmax.f32 %v3706_v56, 0.0  ;;  %v4288_v41 = vmax.f32 %v3717_v32, 0.0  ;;  %v4298_v56 = vld [vmem:[#allocation13_spill] sm:$0xff]  ;;  %v4300_v32 = vld [vmem:[#allocation11_spill] sm:$0xff] }
 0x3c7   :  { %2242 = vmatprep.subr.bf16.mxu0 %v2336_v34  ;;  %v2255_v48 = vpack.c.bf16 %v4238_v18, %v4237_v10  ;;  %v4248_v10 = vmax.f32 %v3557_v6, 0.0  ;;  %v4255_v6 = vmax.f32 %v3578_v24, 0.0  ;;  %v4262_v24 = vmax.f32 %v3613_v33, 0.0 }
 0x3c8   :  { %v4269_v33 = vmax.f32 %v3634_v36, 0.0  ;;  %v4276_v36 = vmax.f32 %v3669_v26, 0.0  ;;  %v4283_v26 = vmax.f32 %v3690_v25, 0.0  ;;  %v4290_v25 = vld [vmem:[#allocation10_spill] sm:$0xff] }
 0x3c9   :  { %v4291_v18 = vmax.f32 %v4290_v25, 0.0 }
 0x3ca   :  { %2244 = vmatpush1.bf16.msra.mxu0 %v2243_v57  ;;  %v4240_v57 = vld [vmem:[#allocation56_spill] sm:$0xff] }
 0x3cb   :  { %2245 = vmatprep.subr.bf16.mxu0 %v2336_v34  ;;  %v2258_v1 = vpack.c.bf16 %v4240_v57, %v4239_v50  ;;  %v4295_v50 = vmax.f32 %v4294_v44, 0.0 }
 0x3ce   :  { %2247 = vmatpush1.bf16.msra.mxu0 %v2246_v51  ;;  %v4242_v51 = vld [vmem:[#allocation58_spill] sm:$0xff] }
 0x3cf   :  { %2248 = vmatprep.subr.bf16.mxu0 %v2336_v34  ;;  %v2261_v28 = vpack.c.bf16 %v4242_v51, %v4241_v20  ;;  %v4301_v20 = vmax.f32 %v4300_v32, 0.0 }
 0x3d2   :  { %2250 = vmatpush1.bf16.msra.mxu0 %v2249_v7  ;;  %v4244_v7 = vmax.f32 %v3541_v31, 0.0  ;;  %v4251_v31 = vmax.f32 %v3562_v17, 0.0  ;;  %v4258_v17 = vmax.f32 %v3597_v35, 0.0  ;;  %v4265_v35 = vmax.f32 %v3618_v49, 0.0 }
 0x3d3   :  { %2251 = vmatprep.subr.bf16.mxu0 %v2336_v34  ;;  %v4272_v49 = vmax.f32 %v3653_v22, 0.0  ;;  %v4279_v22 = vmax.f32 %v3674_v61, 0.0  ;;  %v4286_v61 = vmax.f32 %v3709_v63, 0.0  ;;  %v4296_v63 = vld [vmem:[#allocation12_spill] sm:$0xff] }
 0x3d4   :  { %v4297_v57 = vmax.f32 %v4296_v63, 0.0 }
 0x3d6   :  { %2253 = vmatpush1.bf16.msra.mxu0 %v2252_v9  ;;  %v4247_v9 = vmax.f32 %v3546_v16, 0.0  ;;  %v4254_v16 = vmax.f32 %v3581_v59, 0.0  ;;  %v4261_v59 = vmax.f32 %v3602_v12, 0.0  ;;  %v4268_v12 = vmax.f32 %v3637_v40, 0.0 }
 0x3d7   :  { %2254 = vmatprep.subr.bf16.mxu0 %v2336_v34  ;;  %v4275_v40 = vmax.f32 %v3658_v15, 0.0  ;;  %v4282_v15 = vmax.f32 %v3693_v39, 0.0  ;;  %v4289_v39 = vmax.f32 %v3714_v52, 0.0  ;;  %v4302_v52 = vld [vmem:[#allocation18_spill] sm:$0xff] }
 0x3d8   :  { %v4303_v51 = vmax.f32 %v4302_v52, 0.0 }
 0x3da   :  { %2256 = vmatpush1.bf16.msra.mxu0 %v2255_v48 }
 0x3db   :  { %2257 = vmatprep.subr.bf16.mxu0 %v2336_v34 }
 0x3de   :  { %2259 = vmatpush1.bf16.msra.mxu0 %v2258_v1  ;;  %v4299_v1 = vmax.f32 %v4298_v56, 0.0 }
 0x3df   :  { %2260 = vmatprep.subr.bf16.mxu0 %v2336_v34  ;;  %v4249_v34 = vmax.f32 %v3554_v5, 0.0  ;;  %v4256_v5 = vmax.f32 %v3589_v43, 0.0  ;;  %v4263_v43 = vmax.f32 %v3610_v55, 0.0  ;;  %v4270_v55 = vmax.f32 %v3645_v3, 0.0 }
 0x3e0   :  { %v4277_v3 = vmax.f32 %v3666_v11, 0.0  ;;  %v4284_v11 = vmax.f32 %v3701_v19, 0.0  ;;  %v4292_v19 = vld [vmem:[#allocation9_spill] sm:$0xff] }
 0x3e1   :  { %v4293_v48 = vmax.f32 %v4292_v19, 0.0 }
 0x3e2   :  { %2262 = vmatpush1.bf16.msra.mxu0 %v2261_v28  ;;  %v4304_v28 = vld [vmem:[#allocation16_spill] sm:$0xff] }
 0x3e5   :  { %1789 = vmatmul.mubr.f32.vlgmr.msra.gmra.mrb[32].mxu0 %v4243_v38  ;;  %v4305_v38 = vmax.f32 %v4304_v28, 0.0 }
 0x3e6   :  { %1793 = vmatprep.mubr.f32.mxu0 %v4244_v7  ;;  %v4306_v7 = vld [vmem:[#allocation17_spill] sm:$0xff] }
 0x3e9   :  { %1794 = vmatmul.mubr.f32.gmra.mrb[34].mxu0 %v4245_v13  ;;  %v4307_v13 = vmax.f32 %v4306_v7, 0.0 }
 0x3ea   :  { %1798 = vmatprep.mubr.f32.mxu0 %v4246_v21  ;;  %v4308_v21 = vld [vmem:[#allocation15_spill] sm:$0xff] }
 0x3ed   :  { %1799 = vmatmul.mubr.f32.gmra.mrb[36].mxu0 %v4247_v9  ;;  %v4309_v9 = vmax.f32 %v4308_v21, 0.0 }
 0x3ee   :  { %1803 = vmatprep.mubr.f32.mxu0 %v4248_v10  ;;  %v4310_v10 = vld [vmem:[#allocation22_spill] sm:$0xff] }
 0x3f1   :  { %1804 = vmatmul.mubr.f32.gmra.mrb[38].mxu0 %v4249_v34  ;;  %v4311_v34 = vmax.f32 %v4310_v10, 0.0 }
 0x3f2   :  { %1808 = vmatprep.mubr.f32.mxu0 %v4250_v27  ;;  %v4312_v27 = vld [vmem:[#allocation20_spill] sm:$0xff] }
 0x3f5   :  { %1809 = vmatmul.mubr.f32.gmra.mrb[40].mxu0 %v4251_v31  ;;  %v4313_v31 = vmax.f32 %v4312_v27, 0.0 }
 0x3f6   :  { %1813 = vmatprep.mubr.f32.mxu0 %v4252_v29  ;;  %v4314_v29 = vmax.f32 %v3773_v0, 0.0 }
 0x3f9   :  { %1814 = vmatmul.mubr.f32.gmra.mrb[42].mxu0 %v4253_v60  ;;  %v4315_v60 = vmax.f32 %v3770_v37, 0.0 }
 0x3fa   :  { %1818 = vmatprep.mubr.f32.mxu0 %v4254_v16  ;;  %v4316_v16 = vld [vmem:[#allocation21_spill] sm:$0xff] }
 0x3fd   :  { %1819 = vmatmul.mubr.f32.gmra.mrb[44].mxu0 %v4255_v6  ;;  %v4317_v6 = vmax.f32 %v4316_v16, 0.0 }
 0x3fe   :  { %1823 = vmatprep.mubr.f32.mxu0 %v4256_v5  ;;  %v4318_v5 = vld [vmem:[#allocation19_spill] sm:$0xff] }
 0x401   :  { %1824 = vmatmul.mubr.f32.gmra.mrb[46].mxu0 %v4257_v8  ;;  %v4319_v8 = vmax.f32 %v4318_v5, 0.0 }
 0x402   :  { %1828 = vmatprep.mubr.f32.mxu0 %v4258_v17  ;;  %v3948_v17 = vld [vmem:[%s4086_s8] ss:$0 sm:$0xff] }
 0x405   :  { %1829 = vmatmul.mubr.f32.gmra.mrb[48].mxu0 %v4259_v62 }
 0x406   :  { %1833 = vmatprep.mubr.f32.mxu0 %v4260_v14 }
 0x409   :  { %1834 = vmatmul.mubr.f32.gmra.mrb[50].mxu0 %v4261_v59 }
 0x40a   :  { %1838 = vmatprep.mubr.f32.mxu0 %v4262_v24 }
 0x40d   :  { %1839 = vmatmul.mubr.f32.gmra.mrb[52].mxu0 %v4263_v43 }
 0x40e   :  { %1843 = vmatprep.mubr.f32.mxu0 %v4264_v46 }
 0x411   :  { %1844 = vmatmul.mubr.f32.gmra.mrb[54].mxu0 %v4265_v35 }
 0x412   :  { %1848 = vmatprep.mubr.f32.mxu0 %v4266_v54 }
 0x415   :  { %1849 = vmatmul.mubr.f32.gmra.mrb[56].mxu0 %v4267_v47 }
 0x416   :  { %1853 = vmatprep.mubr.f32.mxu0 %v4268_v12 }
 0x419   :  { %1854 = vmatmul.mubr.f32.gmra.mrb[58].mxu0 %v4269_v33 }
 0x41a   :  { %1858 = vmatprep.mubr.f32.mxu0 %v4270_v55 }
 0x41d   :  { %1859 = vmatmul.mubr.f32.gmra.mrb[60].mxu0 %v4271_v4 }
 0x41e   :  { %1863 = vmatprep.mubr.f32.mxu0 %v4272_v49 }
 0x421   :  { %1864 = vmatmul.mubr.f32.gmra.mrb[62].mxu0 %v4273_v23 }
 0x422   :  { %1868 = vmatprep.mubr.f32.mxu0 %v4274_v53 }
 0x425   :  { %1869 = vmatmul.mubr.f32.gmra.mrb[64].mxu0 %v4275_v40 }
 0x426   :  { %1873 = vmatprep.mubr.f32.mxu0 %v4276_v36 }
 0x429   :  { %1874 = vmatmul.mubr.f32.gmra.mrb[66].mxu0 %v4277_v3 }
 0x42a   :  { %1878 = vmatprep.mubr.f32.mxu0 %v4278_v2 }
 0x42d   :  { %1879 = vmatmul.mubr.f32.gmra.mrb[68].mxu0 %v4279_v22 }
 0x42e   :  { %1883 = vmatprep.mubr.f32.mxu0 %v4280_v30 }
 0x431   :  { %1884 = vmatmul.mubr.f32.gmra.mrb[70].mxu0 %v4281_v45 }
 0x432   :  { %1888 = vmatprep.mubr.f32.mxu0 %v4282_v15 }
 0x435   :  { %1889 = vmatmul.mubr.f32.gmra.mrb[72].mxu0 %v4283_v26 }
 0x436   :  { %1893 = vmatprep.mubr.f32.mxu0 %v4284_v11 }
 0x439   :  { %1894 = vmatmul.mubr.f32.gmra.mrb[74].mxu0 %v4285_v58 }
 0x43a   :  { %1898 = vmatprep.mubr.f32.mxu0 %v4286_v61 }
 0x43d   :  { %1899 = vmatmul.mubr.f32.gmra.mrb[76].mxu0 %v4287_v42 }
 0x43e   :  { %1903 = vmatprep.mubr.f32.mxu0 %v4288_v41 }
 0x441   :  { %1904 = vmatmul.mubr.f32.gmra.mrb[78].mxu0 %v4289_v39 }
 0x442   :  { %1908 = vmatprep.mubr.f32.mxu0 %v4291_v18 }
 0x445   :  { %1909 = vmatmul.mubr.f32.gmra.mrb[80].mxu0 %v4293_v48 }
 0x446   :  { %1913 = vmatprep.mubr.f32.mxu0 %v4295_v50 }
 0x449   :  { %1914 = vmatmul.mubr.f32.gmra.mrb[82].mxu0 %v4297_v57 }
 0x44a   :  { %1918 = vmatprep.mubr.f32.mxu0 %v4299_v1 }
 0x44d   :  { %1919 = vmatmul.mubr.f32.gmra.mrb[84].mxu0 %v4301_v20 }
 0x44e   :  { %1923 = vmatprep.mubr.f32.mxu0 %v4303_v51 }
 0x451   :  { %1924 = vmatmul.mubr.f32.gmra.mrb[86].mxu0 %v4305_v38 }
 0x452   :  { %1928 = vmatprep.mubr.f32.mxu0 %v4307_v13 }
 0x455   :  { %1929 = vmatmul.mubr.f32.gmra.mrb[88].mxu0 %v4309_v9 }
 0x456   :  { %1933 = vmatprep.mubr.f32.mxu0 %v4311_v34 }
 0x459   :  { %1934 = vmatmul.mubr.f32.gmra.mrb[90].mxu0 %v4313_v31 }
 0x45a   :  { %1938 = vmatprep.mubr.f32.mxu0 %v4314_v29 }
 0x45d   :  { %1939 = vmatmul.mubr.f32.gmra.mrb[92].mxu0 %v4315_v60 }
 0x45e   :  { %1943 = vmatprep.mubr.f32.mxu0 %v4317_v6 }
 0x461   :  { %1944 = vmatmul.mubr.f32.gmra.mrb[94].mxu0 %v4319_v8 }
 0x4b8   :  { %v1790_v62 = vpop.f32.mrb[32].mxu0 }
 0x4b9   :  { %v1791_v14 = vadd.f32 %v3948_v17, %v1790_v62  ;;  %v1792_v59 = vpop.f32.mrb[33].mxu0 }
 0x4bb   :  { %1949 = vst [vmem:[%s4089_s11] sm:$0xff] %v1791_v14 }
 0x4bc   :  { %v1795_v0 = vpop.f32.mrb[34].mxu0 }
 0x4bd   :  { %v1796_v37 = vadd.f32 %v3948_v17, %v1795_v0  ;;  %v1797_v24 = vpop.f32.mrb[35].mxu0 }
 0x4bf   :  { %1950 = vst [vmem:[%s4089_s11 + $0x8] sm:$0xff] %v1796_v37 }
 0x4c0   :  { %v1800_v43 = vpop.f32.mrb[36].mxu0 }
 0x4c1   :  { %v1801_v46 = vadd.f32 %v3948_v17, %v1800_v43  ;;  %v1802_v35 = vpop.f32.mrb[37].mxu0 }
 0x4c3   :  { %1951 = vst [vmem:[%s4089_s11 + $0x10] sm:$0xff] %v1801_v46 }
 0x4c4   :  { %v1805_v54 = vpop.f32.mrb[38].mxu0 }
 0x4c5   :  { %v1806_v47 = vadd.f32 %v3948_v17, %v1805_v54  ;;  %v1807_v12 = vpop.f32.mrb[39].mxu0 }
 0x4c7   :  { %1952 = vst [vmem:[%s4089_s11 + $0x18] sm:$0xff] %v1806_v47 }
 0x4c8   :  { %v1810_v33 = vpop.f32.mrb[40].mxu0 }
 0x4c9   :  { %v1811_v55 = vadd.f32 %v3948_v17, %v1810_v33  ;;  %v1812_v4 = vpop.f32.mrb[41].mxu0 }
 0x4cb   :  { %1953 = vst [vmem:[%s4089_s11 + $0x20] sm:$0xff] %v1811_v55 }
 0x4cc   :  { %v1815_v49 = vpop.f32.mrb[42].mxu0 }
 0x4cd   :  { %v1816_v23 = vadd.f32 %v3948_v17, %v1815_v49  ;;  %v1817_v53 = vpop.f32.mrb[43].mxu0 }
 0x4cf   :  { %1954 = vst [vmem:[%s4089_s11 + $0x28] sm:$0xff] %v1816_v23 }
 0x4d0   :  { %v1820_v40 = vpop.f32.mrb[44].mxu0 }
 0x4d1   :  { %v1821_v36 = vadd.f32 %v3948_v17, %v1820_v40  ;;  %v1822_v3 = vpop.f32.mrb[45].mxu0 }
 0x4d3   :  { %1955 = vst [vmem:[%s4089_s11 + $0x30] sm:$0xff] %v1821_v36 }
 0x4d4   :  { %v1825_v2 = vpop.f32.mrb[46].mxu0 }
 0x4d5   :  { %v1826_v22 = vadd.f32 %v3948_v17, %v1825_v2  ;;  %v1827_v30 = vpop.f32.mrb[47].mxu0 }
 0x4d7   :  { %1956 = vst [vmem:[%s4089_s11 + $0x38] sm:$0xff] %v1826_v22 }
 0x4d8   :  { %v1830_v45 = vpop.f32.mrb[48].mxu0 }
 0x4d9   :  { %v1831_v15 = vadd.f32 %v3948_v17, %v1830_v45  ;;  %v1832_v26 = vpop.f32.mrb[49].mxu0 }
 0x4db   :  { %1957 = vst [vmem:[%s4089_s11 + $0x40] sm:$0xff] %v1831_v15 }
 0x4dc   :  { %v1835_v11 = vpop.f32.mrb[50].mxu0 }
 0x4dd   :  { %v1836_v58 = vadd.f32 %v3948_v17, %v1835_v11  ;;  %v1837_v61 = vpop.f32.mrb[51].mxu0 }
 0x4df   :  { %1958 = vst [vmem:[%s4089_s11 + $0x48] sm:$0xff] %v1836_v58 }
 0x4e0   :  { %v1840_v42 = vpop.f32.mrb[52].mxu0 }
 0x4e1   :  { %v1841_v41 = vadd.f32 %v3948_v17, %v1840_v42  ;;  %v1842_v39 = vpop.f32.mrb[53].mxu0 }
 0x4e3   :  { %1959 = vst [vmem:[%s4089_s11 + $0x50] sm:$0xff] %v1841_v41 }
 0x4e4   :  { %v1845_v25 = vpop.f32.mrb[54].mxu0 }
 0x4e5   :  { %v1846_v18 = vadd.f32 %v3948_v17, %v1845_v25  ;;  %v1847_v19 = vpop.f32.mrb[55].mxu0 }
 0x4e7   :  { %1960 = vst [vmem:[%s4089_s11 + $0x58] sm:$0xff] %v1846_v18 }
 0x4e8   :  { %v1850_v48 = vpop.f32.mrb[56].mxu0 }
 0x4e9   :  { %v1851_v44 = vadd.f32 %v3948_v17, %v1850_v48  ;;  %v1852_v50 = vpop.f32.mrb[57].mxu0 }
 0x4eb   :  { %1961 = vst [vmem:[%s4089_s11 + $0x60] sm:$0xff] %v1851_v44 }
 0x4ec   :  { %v1855_v63 = vpop.f32.mrb[58].mxu0 }
 0x4ed   :  { %v1856_v57 = vadd.f32 %v3948_v17, %v1855_v63  ;;  %v1857_v56 = vpop.f32.mrb[59].mxu0 }
 0x4ef   :  { %1962 = vst [vmem:[%s4089_s11 + $0x68] sm:$0xff] %v1856_v57 }
 0x4f0   :  { %v1860_v1 = vpop.f32.mrb[60].mxu0 }
 0x4f1   :  { %v1861_v32 = vadd.f32 %v3948_v17, %v1860_v1  ;;  %v1862_v20 = vpop.f32.mrb[61].mxu0 }
 0x4f3   :  { %1963 = vst [vmem:[%s4089_s11 + $0x70] sm:$0xff] %v1861_v32 }
 0x4f4   :  { %v1865_v52 = vpop.f32.mrb[62].mxu0 }
 0x4f5   :  { %v1866_v51 = vadd.f32 %v3948_v17, %v1865_v52  ;;  %v1867_v28 = vpop.f32.mrb[63].mxu0 }
 0x4f7   :  { %1964 = vst [vmem:[%s4089_s11 + $0x78] sm:$0xff] %v1866_v51 }
 0x4f8   :  { %v1870_v38 = vpop.f32.mrb[64].mxu0 }
 0x4f9   :  { %v1871_v7 = vadd.f32 %v3948_v17, %v1870_v38  ;;  %v1872_v13 = vpop.f32.mrb[65].mxu0 }
 0x4fb   :  { %1965 = vst [vmem:[%s4089_s11 + $0x80] sm:$0xff] %v1871_v7 }
 0x4fc   :  { %v1875_v21 = vpop.f32.mrb[66].mxu0 }
 0x4fd   :  { %v1876_v9 = vadd.f32 %v3948_v17, %v1875_v21  ;;  %v1877_v10 = vpop.f32.mrb[67].mxu0 }
 0x4ff   :  { %1966 = vst [vmem:[%s4089_s11 + $0x88] sm:$0xff] %v1876_v9 }
 0x500   :  { %v1880_v34 = vpop.f32.mrb[68].mxu0 }
 0x501   :  { %v1881_v27 = vadd.f32 %v3948_v17, %v1880_v34  ;;  %v1882_v31 = vpop.f32.mrb[69].mxu0 }
 0x503   :  { %1967 = vst [vmem:[%s4089_s11 + $0x90] sm:$0xff] %v1881_v27 }
 0x504   :  { %v1885_v29 = vpop.f32.mrb[70].mxu0 }
 0x505   :  { %v1886_v60 = vadd.f32 %v3948_v17, %v1885_v29  ;;  %v1887_v16 = vpop.f32.mrb[71].mxu0 }
 0x507   :  { %1968 = vst [vmem:[%s4089_s11 + $0x98] sm:$0xff] %v1886_v60 }
 0x508   :  { %v1890_v6 = vpop.f32.mrb[72].mxu0 }
 0x509   :  { %v1891_v5 = vadd.f32 %v3948_v17, %v1890_v6  ;;  %v1892_v8 = vpop.f32.mrb[73].mxu0 }
 0x50b   :  { %1969 = vst [vmem:[%s4089_s11 + $0xa0] sm:$0xff] %v1891_v5 }
 0x50c   :  { %v1895_v62 = vpop.f32.mrb[74].mxu0 }
 0x50d   :  { %v1896_v14 = vadd.f32 %v3948_v17, %v1895_v62  ;;  %v1897_v59 = vpop.f32.mrb[75].mxu0 }
 0x50f   :  { %1970 = vst [vmem:[%s4089_s11 + $0xa8] sm:$0xff] %v1896_v14 }
 0x510   :  { %v1900_v0 = vpop.f32.mrb[76].mxu0 }
 0x511   :  { %v1901_v37 = vadd.f32 %v3948_v17, %v1900_v0  ;;  %v1902_v24 = vpop.f32.mrb[77].mxu0 }
 0x513   :  { %1971 = vst [vmem:[%s4089_s11 + $0xb0] sm:$0xff] %v1901_v37 }
 0x514   :  { %v1905_v43 = vpop.f32.mrb[78].mxu0 }
 0x515   :  { %v1906_v46 = vadd.f32 %v3948_v17, %v1905_v43  ;;  %v1907_v35 = vpop.f32.mrb[79].mxu0 }
 0x517   :  { %1972 = vst [vmem:[%s4089_s11 + $0xb8] sm:$0xff] %v1906_v46 }
 0x518   :  { %v1910_v54 = vpop.f32.mrb[80].mxu0 }
 0x519   :  { %v1911_v47 = vadd.f32 %v3948_v17, %v1910_v54  ;;  %v1912_v12 = vpop.f32.mrb[81].mxu0 }
 0x51b   :  { %1973 = vst [vmem:[%s4089_s11 + $0xc0] sm:$0xff] %v1911_v47 }
 0x51c   :  { %v1915_v33 = vpop.f32.mrb[82].mxu0 }
 0x51d   :  { %v1916_v55 = vadd.f32 %v3948_v17, %v1915_v33  ;;  %v1917_v4 = vpop.f32.mrb[83].mxu0 }
 0x51f   :  { %1974 = vst [vmem:[%s4089_s11 + $0xc8] sm:$0xff] %v1916_v55 }
 0x520   :  { %v1920_v49 = vpop.f32.mrb[84].mxu0 }
 0x521   :  { %v1921_v23 = vadd.f32 %v3948_v17, %v1920_v49  ;;  %v1922_v53 = vpop.f32.mrb[85].mxu0 }
 0x523   :  { %1975 = vst [vmem:[%s4089_s11 + $0xd0] sm:$0xff] %v1921_v23 }
 0x524   :  { %v1925_v40 = vpop.f32.mrb[86].mxu0 }
 0x525   :  { %v1926_v36 = vadd.f32 %v3948_v17, %v1925_v40  ;;  %v1927_v3 = vpop.f32.mrb[87].mxu0 }
 0x527   :  { %1976 = vst [vmem:[%s4089_s11 + $0xd8] sm:$0xff] %v1926_v36 }
 0x528   :  { %v1930_v2 = vpop.f32.mrb[88].mxu0 }
 0x529   :  { %v1931_v22 = vadd.f32 %v3948_v17, %v1930_v2  ;;  %v1932_v30 = vpop.f32.mrb[89].mxu0 }
 0x52b   :  { %1977 = vst [vmem:[%s4089_s11 + $0xe0] sm:$0xff] %v1931_v22 }
 0x52c   :  { %v1935_v45 = vpop.f32.mrb[90].mxu0 }
 0x52d   :  { %v1936_v15 = vadd.f32 %v3948_v17, %v1935_v45  ;;  %v1937_v26 = vpop.f32.mrb[91].mxu0 }
 0x52f   :  { %1978 = vst [vmem:[%s4089_s11 + $0xe8] sm:$0xff] %v1936_v15 }
 0x530   :  { %v1940_v11 = vpop.f32.mrb[92].mxu0 }
 0x531   :  { %v1941_v58 = vadd.f32 %v3948_v17, %v1940_v11  ;;  %v1942_v61 = vpop.f32.mrb[93].mxu0 }
 0x533   :  { %1979 = vst [vmem:[%s4089_s11 + $0xf0] sm:$0xff] %v1941_v58 }
 0x534   :  { %v1945_v42 = vpop.f32.mrb[94].mxu0 }
 0x535   :  { %v1946_v41 = vadd.f32 %v3948_v17, %v1945_v42  ;;  %v1947_v39 = vpop.f32.mrb[95].mxu0 }
 0x537   :  { %1980 = vst [vmem:[%s4089_s11 + $0xf8] sm:$0xff] %v1946_v41 }
 0x538   :  { %1985 = vsyncmov [#allocation4] }
 0x53b   :  { %s1986_s8 = vpop.sfrf %1985 }
 0x53c   :  { %p2081_p0 = scmp.ne.s32.totalorder %s1986_s8, 0 }
 0x53e   :  { %1990 = shalt.err (%p2081_p0)  }
 0x53f   :  { %1992 = vsyncmov [#allocation4 + $0x1] }
 0x542   :  { %s1993_s13 = vpop.sfrf %1992 }
 0x543   :  { %p2082_p1 = scmp.ne.s32.totalorder %s1993_s13, 0 }
 0x545   :  { %1997 = shalt.err (%p2082_p1)  }

</bundles_post_ra>
